<compile_context>
chip_gen: v6e
topology: v6e:2x2x1
jax: 0.10.0
libtpu: 0.0.40
codegen_flags: <defaults>
</compile_context>

<pallas_src>
import functools

import numpy as np
import jax
import jax.numpy as jnp
from jax import lax
from jax.experimental import pallas as pl
from jax.experimental.pallas import tpu as pltpu


def _ballq_loss_kernel(sl_ref, pc_q_ref, mask_q_ref, pc_a_ref, mask_a_ref,
                       out_ref, cnt_ref, acc_ref, first_ref,
                       *, k, radius, loss_norm, c_dim):
    n_step = pl.program_id(2)

    @pl.when(n_step == 0)
    def _():
        cnt_ref[...] = jnp.zeros_like(cnt_ref)
        acc_ref[...] = jnp.zeros_like(acc_ref)
        first_ref[...] = jnp.zeros_like(first_ref)

    pc_q = pc_q_ref[0]        # (3, Tq)   queries on lanes
    mask_q = mask_q_ref[0]    # (C, Tq)
    pc_a = pc_a_ref[0]        # (Tn, 3)   neighbour block, points on sublanes
    mask_a = mask_a_ref[0]    # (Tn, C)

    tn = pc_a.shape[0]
    tq = pc_q.shape[1]

    # Pairwise squared distance (Tn, Tq) accumulated per coordinate
    # (no (3, Tn, Tq) temporary).  Keep f32: radius threshold is sensitive.
    dist2 = jnp.zeros((tn, tq), jnp.float32)
    for c in range(3):
        dc = pc_a[:, c:c + 1] - pc_q[c:c + 1, :]
        dist2 = dist2 + dc * dc

    valid_bool = dist2 < jnp.float32(radius * radius)
    valid = valid_bool.astype(jnp.float32)                      # (Tn, Tq)

    # Within-block exclusive valid-count (slot rank of neighbour j for query i)
    # via a strictly-lower-triangular 0/1 matmul on the MXU.  bf16 operands are
    # exact (0/1) and accumulation is f32, so the result is bit-exact.
    local_rank = jnp.dot(sl_ref[...], valid_bool.astype(jnp.bfloat16),
                         preferred_element_type=jnp.float32)    # (Tn, Tq)
    excl_rank = cnt_ref[...] + local_rank    # + valid count of previous blocks

    selected = valid * (excl_rank < jnp.float32(k)).astype(jnp.float32)
    first = valid * (excl_rank == 0.0).astype(jnp.float32)

    # Per-pair mask distance over the class/channel axis.
    if loss_norm == 1:
        diff = jnp.zeros((tn, tq), jnp.float32)
        for c in range(c_dim):
            diff = diff + jnp.abs(mask_a[:, c:c + 1] - mask_q[c:c + 1, :])
    else:
        # Gram identity: ||ma||^2 + ||mq||^2 - 2 ma.mq  (one MXU matmul),
        # clamped to >= 0 before sqrt to avoid NaN from rounding.
        ma2 = jnp.sum(mask_a * mask_a, axis=1, keepdims=True)   # (Tn, 1)
        mq2 = jnp.sum(mask_q * mask_q, axis=0, keepdims=True)   # (1, Tq)
        cross = jnp.dot(mask_a, mask_q,
                        preferred_element_type=jnp.float32)     # (Tn, Tq)
        diff = jnp.sqrt(jnp.maximum(ma2 + mq2 - 2.0 * cross, 0.0))
        # TODO(synk): forward-only; add eps inside sqrt if a VJP is ever needed
        # (self-pair distance is exactly 0 -> NaN gradient through sqrt).

    acc_ref[...] += jnp.sum(selected * diff, axis=0, keepdims=True)
    first_ref[...] += jnp.sum(first * diff, axis=0, keepdims=True)
    cnt_ref[...] += jnp.sum(valid, axis=0, keepdims=True)

    @pl.when(n_step == pl.num_programs(2) - 1)
    def _():
        n_sel = jnp.minimum(cnt_ref[...], jnp.float32(k))       # = min(m, k)
        per_point = (acc_ref[...]
                     + first_ref[...] * (jnp.float32(k) - n_sel)) * (1.0 / k)
        out_ref[...] = per_point[None]                          # (1, 1, Tq)


def ballq_loss(pc, mask, *, k=16, radius=0.2, cross_entropy=False,
               loss_norm=1, tq=256, tn=256):
    """pc: [B, N, 3] float32, mask: [B, N, C] float32 -> scalar loss."""
    # TODO(synk): cross_entropy=True branch (F.binary_cross_entropy) not
    # implemented; the default constructor (cross_entropy=False) is reproduced.
    assert not cross_entropy
    B, N, _ = pc.shape
    C = mask.shape[-1]
    tq = min(tq, N)
    tn = min(tn, N)
    assert N % tq == 0 and N % tn == 0

    pc_nat = pc.astype(jnp.float32)                     # (B, N, 3)  sublane pts
    mask_nat = mask.astype(jnp.float32)                 # (B, N, C)
    pc_t = jnp.transpose(pc_nat, (0, 2, 1))             # (B, 3, N)  lane pts
    mask_t = jnp.transpose(mask_nat, (0, 2, 1))         # (B, C, N)

    # Strictly-lower-triangular 0/1 matrix, built once (bf16, exact), kept
    # resident in the kernel (constant index_map).
    rows = lax.broadcasted_iota(jnp.int32, (tn, tn), 0)   # j
    cols = lax.broadcasted_iota(jnp.int32, (tn, tn), 1)   # j'
    strict_lower = (cols < rows).astype(jnp.bfloat16)     # SL[j, j'] = [j' < j]

    nq, nn = N // tq, N // tn
    kernel = functools.partial(_ballq_loss_kernel, k=k, radius=radius,
                               loss_norm=loss_norm, c_dim=C)

    per_point = pl.pallas_call(
        kernel,
        out_shape=jax.ShapeDtypeStruct((B, 1, N), jnp.float32),
        grid_spec=pltpu.PrefetchScalarGridSpec(
            num_scalar_prefetch=0,
            grid=(B, nq, nn),
            in_specs=[
                pl.BlockSpec((tn, tn), lambda b, q, n: (0, 0)),    # tri matrix
                pl.BlockSpec((1, 3, tq), lambda b, q, n: (b, 0, q)),   # query xyz
                pl.BlockSpec((1, C, tq), lambda b, q, n: (b, 0, q)),   # query mask
                pl.BlockSpec((1, tn, 3), lambda b, q, n: (b, n, 0)),   # nbr xyz
                pl.BlockSpec((1, tn, C), lambda b, q, n: (b, n, 0)),   # nbr mask
            ],
            out_specs=pl.BlockSpec((1, 1, tq), lambda b, q, n: (b, 0, q)),
            scratch_shapes=[
                pltpu.VMEM((1, tq), jnp.float32),   # running valid count
                pltpu.VMEM((1, tq), jnp.float32),   # running selected-loss sum
                pltpu.VMEM((1, tq), jnp.float32),   # first-neighbour diff
            ],
        ),
        compiler_params=pltpu.CompilerParams(
            dimension_semantics=("parallel", "parallel", "arbitrary"),
            vmem_limit_bytes=32 * 1024 * 1024),
    )(strict_lower, pc_t, mask_t, pc_nat, mask_nat)

    return jnp.mean(per_point)


def _reference_loss(pc, mask, k, radius, loss_norm):
    """Pure numpy reference reproducing ball_query + grouping + norm loss."""
    B, N, C = mask.shape
    mask_t = mask.transpose(0, 2, 1)  # (B, C, N)
    batch_losses = []
    for b in range(B):
        diff_xyz = pc[b, :, None, :] - pc[b, None, :, :]
        d2 = (diff_xyz * diff_xyz).sum(-1)
        per_point = np.zeros(N, dtype=np.float64)
        r2 = np.float32(radius * radius)
        for i in range(N):
            idx = np.zeros(k, dtype=np.int64)
            cnt = 0
            for j in range(N):
                if d2[i, j] < r2:
                    if cnt == 0:
                        idx[:] = j
                    idx[cnt] = j
                    cnt += 1
                    if cnt >= k:
                        break
            nn_m = mask_t[b][:, idx]            # (C, k)
            dv = mask_t[b][:, i:i + 1] - nn_m   # (C, k)
            if loss_norm == 1:
                dist = np.abs(dv).sum(0)
            else:
                dist = np.sqrt((dv * dv).sum(0))
            per_point[i] = dist.mean()
        batch_losses.append(per_point.mean())
    return float(np.mean(batch_losses))


if __name__ == "__main__":
    key = jax.random.PRNGKey(0)
    kp, km = jax.random.split(key)

    B, N, C = 2, 256, 8          # small shapes: B batches, N points, C channels
    k_nn, radius = 16, 0.2

    pc = jax.random.uniform(kp, (B, N, 3), dtype=jnp.float32)
    mask = jax.nn.softmax(
        jax.random.normal(km, (B, N, C), dtype=jnp.float32), axis=-1)

    # L1 (module default), small tiles so the multi-block carried scan
    # (2 query tiles x 2 neighbour blocks) is exercised.
    loss_l1 = jax.block_until_ready(
        ballq_loss(pc, mask, k=k_nn, radius=radius, loss_norm=1, tq=128, tn=128))
    ref_l1 = _reference_loss(np.asarray(pc), np.asarray(mask), k_nn, radius, 1)
    assert np.allclose(float(loss_l1), ref_l1, rtol=1e-4, atol=1e-5), \
        (float(loss_l1), ref_l1)

    # L2 path (Gram identity), default 256-wide tiles.
    loss_l2 = jax.block_until_ready(
        ballq_loss(pc, mask, k=k_nn, radius=radius, loss_norm=2))
    ref_l2 = _reference_loss(np.asarray(pc), np.asarray(mask), k_nn, radius, 2)
    assert np.allclose(float(loss_l2), ref_l2, rtol=1e-3, atol=1e-4), \
        (float(loss_l2), ref_l2)

    print("KERNEL_OK")
</pallas_src>

<mosaic_0001>
module attributes {stable_mosaic.version = 11 : i64} {
  func.func @_ballq_loss_kernel(%arg0: i32, %arg1: i32, %arg2: i32, %arg3: memref<128x128xbf16, #tpu.memory_space<vmem>>, %arg4: memref<1x3x128xf32, #tpu.memory_space<vmem>>, %arg5: memref<1x8x128xf32, #tpu.memory_space<vmem>>, %arg6: memref<1x128x3xf32, #tpu.memory_space<vmem>>, %arg7: memref<1x128x8xf32, #tpu.memory_space<vmem>>, %arg8: memref<1x1x128xf32, #tpu.memory_space<vmem>>, %arg9: memref<1x128xf32, #tpu.memory_space<vmem>>, %arg10: memref<1x128xf32, #tpu.memory_space<vmem>>, %arg11: memref<1x128xf32, #tpu.memory_space<vmem>>) attributes {dimension_semantics = [#tpu.dimension_semantics<parallel>, #tpu.dimension_semantics<parallel>, #tpu.dimension_semantics<arbitrary>], iteration_bounds = array<i64: 2, 2, 2>, scalar_prefetch = 0 : i64, scratch_operands = 3 : i64, tpu.core_type = #tpu.core_type<tc>, window_params = [{pipeline_mode = #tpu.pipeline_mode<synchronous>, transform_indices = @transform_0, window_bounds = array<i64: 128, 128>}, {transform_indices = @transform_1, window_bounds = array<i64: 1, 3, 128>}, {transform_indices = @transform_2, window_bounds = array<i64: 1, 8, 128>}, {transform_indices = @transform_3, window_bounds = array<i64: 1, 128, 3>}, {transform_indices = @transform_4, window_bounds = array<i64: 1, 128, 8>}, {transform_indices = @transform_5, window_bounds = array<i64: 1, 1, 128>}]} {
    %c0_i32 = arith.constant 0 : i32
    %0 = arith.cmpi eq, %arg2, %c0_i32 : i32
    %1 = arith.extui %0 : i1 to i32
    %c0_i32_0 = arith.constant 0 : i32
    %2 = arith.cmpi ne, %1, %c0_i32_0 : i32
    scf.if %2 {
      %cst_37 = arith.constant 0.000000e+00 : f32
      %132 = vector.broadcast %cst_37 : f32 to vector<1x128xf32>
      %c0_38 = arith.constant 0 : index
      %c0_39 = arith.constant 0 : index
      %133 = vector.load %arg9[%c0_38, %c0_39] : memref<1x128xf32, #tpu.memory_space<vmem>>, vector<1x128xf32>
      tpu.vector_store %arg9[%c0_38, %c0_39], %132 {strides = array<i32>} : memref<1x128xf32, #tpu.memory_space<vmem>>, vector<1x128xf32>,
      %cst_40 = arith.constant 0.000000e+00 : f32
      %134 = vector.broadcast %cst_40 : f32 to vector<1x128xf32>
      %c0_41 = arith.constant 0 : index
      %c0_42 = arith.constant 0 : index
      %135 = vector.load %arg10[%c0_41, %c0_42] : memref<1x128xf32, #tpu.memory_space<vmem>>, vector<1x128xf32>
      tpu.vector_store %arg10[%c0_41, %c0_42], %134 {strides = array<i32>} : memref<1x128xf32, #tpu.memory_space<vmem>>, vector<1x128xf32>,
      %cst_43 = arith.constant 0.000000e+00 : f32
      %136 = vector.broadcast %cst_43 : f32 to vector<1x128xf32>
      %c0_44 = arith.constant 0 : index
      %c0_45 = arith.constant 0 : index
      %137 = vector.load %arg11[%c0_44, %c0_45] : memref<1x128xf32, #tpu.memory_space<vmem>>, vector<1x128xf32>
      tpu.vector_store %arg11[%c0_44, %c0_45], %136 {strides = array<i32>} : memref<1x128xf32, #tpu.memory_space<vmem>>, vector<1x128xf32>,
    } else {
    }
    %c0 = arith.constant 0 : index
    %c0_1 = arith.constant 0 : index
    %c0_2 = arith.constant 0 : index
    %3 = vector.load %arg4[%c0, %c0_1, %c0_2] : memref<1x3x128xf32, #tpu.memory_space<vmem>>, vector<1x3x128xf32>
    %4 = vector.shape_cast %3 : vector<1x3x128xf32> to vector<3x128xf32>
    %c0_3 = arith.constant 0 : index
    %c0_4 = arith.constant 0 : index
    %c0_5 = arith.constant 0 : index
    %5 = vector.load %arg5[%c0_3, %c0_4, %c0_5] : memref<1x8x128xf32, #tpu.memory_space<vmem>>, vector<1x8x128xf32>
    %6 = vector.shape_cast %5 : vector<1x8x128xf32> to vector<8x128xf32>
    %c0_6 = arith.constant 0 : index
    %c0_7 = arith.constant 0 : index
    %c0_8 = arith.constant 0 : index
    %7 = vector.load %arg6[%c0_6, %c0_7, %c0_8] : memref<1x128x3xf32, #tpu.memory_space<vmem>>, vector<1x128x3xf32>
    %8 = vector.shape_cast %7 : vector<1x128x3xf32> to vector<128x3xf32>
    %c0_9 = arith.constant 0 : index
    %c0_10 = arith.constant 0 : index
    %c0_11 = arith.constant 0 : index
    %9 = vector.load %arg7[%c0_9, %c0_10, %c0_11] : memref<1x128x8xf32, #tpu.memory_space<vmem>>, vector<1x128x8xf32>
    %10 = vector.shape_cast %9 : vector<1x128x8xf32> to vector<128x8xf32>
    %cst = arith.constant 0.000000e+00 : f32
    %11 = vector.broadcast %cst : f32 to vector<128x128xf32>
    %12 = vector.extract_strided_slice %8 {offsets = [0, 0], sizes = [128, 1], strides = [1, 1]} : vector<128x3xf32> to vector<128x1xf32>
    %13 = vector.extract_strided_slice %4 {offsets = [0, 0], sizes = [1, 128], strides = [1, 1]} : vector<3x128xf32> to vector<1x128xf32>
    %14 = vector.broadcast %12 : vector<128x1xf32> to vector<128x128xf32>
    %15 = vector.broadcast %13 : vector<1x128xf32> to vector<128x128xf32>
    %16 = arith.subf %14, %15 : vector<128x128xf32>
    %17 = arith.mulf %16, %16 : vector<128x128xf32>
    %18 = arith.addf %11, %17 : vector<128x128xf32>
    %19 = vector.extract_strided_slice %8 {offsets = [0, 1], sizes = [128, 1], strides = [1, 1]} : vector<128x3xf32> to vector<128x1xf32>
    %20 = vector.extract_strided_slice %4 {offsets = [1, 0], sizes = [1, 128], strides = [1, 1]} : vector<3x128xf32> to vector<1x128xf32>
    %21 = vector.broadcast %19 : vector<128x1xf32> to vector<128x128xf32>
    %22 = vector.broadcast %20 : vector<1x128xf32> to vector<128x128xf32>
    %23 = arith.subf %21, %22 : vector<128x128xf32>
    %24 = arith.mulf %23, %23 : vector<128x128xf32>
    %25 = arith.addf %18, %24 : vector<128x128xf32>
    %26 = vector.extract_strided_slice %8 {offsets = [0, 2], sizes = [128, 1], strides = [1, 1]} : vector<128x3xf32> to vector<128x1xf32>
    %27 = vector.extract_strided_slice %4 {offsets = [2, 0], sizes = [1, 128], strides = [1, 1]} : vector<3x128xf32> to vector<1x128xf32>
    %28 = vector.broadcast %26 : vector<128x1xf32> to vector<128x128xf32>
    %29 = vector.broadcast %27 : vector<1x128xf32> to vector<128x128xf32>
    %30 = arith.subf %28, %29 : vector<128x128xf32>
    %31 = arith.mulf %30, %30 : vector<128x128xf32>
    %32 = arith.addf %25, %31 : vector<128x128xf32>
    %cst_12 = arith.constant 4.000000e-02 : f32
    %33 = vector.broadcast %cst_12 : f32 to vector<128x128xf32>
    %34 = arith.cmpf olt, %32, %33 : vector<128x128xf32>
    %35 = arith.extui %34 : vector<128x128xi1> to vector<128x128xi32>
    %36 = arith.sitofp %35 : vector<128x128xi32> to vector<128x128xf32>
    %c0_13 = arith.constant 0 : index
    %c0_14 = arith.constant 0 : index
    %37 = vector.load %arg3[%c0_13, %c0_14] : memref<128x128xbf16, #tpu.memory_space<vmem>>, vector<128x128xbf16>
    %38 = arith.extui %34 : vector<128x128xi1> to vector<128x128xi32>
    %39 = arith.sitofp %38 : vector<128x128xi32> to vector<128x128xf32>
    %40 = arith.truncf %39 : vector<128x128xf32> to vector<128x128xbf16>
    %cst_15 = arith.constant dense<0.000000e+00> : vector<128x128xf32>
    %41 = tpu.matmul %37, %40, %cst_15 {dimension_numbers = #tpu.dot_dimension_numbers<[1], [0], [0], [1], [0, 0, 1, 1], [], []>} : vector<128x128xbf16>, vector<128x128xbf16>, vector<128x128xf32> -> vector<128x128xf32>
    %c0_16 = arith.constant 0 : index
    %c0_17 = arith.constant 0 : index
    %42 = vector.load %arg9[%c0_16, %c0_17] : memref<1x128xf32, #tpu.memory_space<vmem>>, vector<1x128xf32>
    %43 = vector.broadcast %42 : vector<1x128xf32> to vector<128x128xf32>
    %44 = arith.addf %43, %41 : vector<128x128xf32>
    %cst_18 = arith.constant 1.600000e+01 : f32
    %45 = vector.broadcast %cst_18 : f32 to vector<128x128xf32>
    %46 = arith.cmpf olt, %44, %45 : vector<128x128xf32>
    %47 = arith.extui %46 : vector<128x128xi1> to vector<128x128xi32>
    %48 = arith.sitofp %47 : vector<128x128xi32> to vector<128x128xf32>
    %49 = arith.mulf %36, %48 : vector<128x128xf32>
    %cst_19 = arith.constant 0.000000e+00 : f32
    %50 = vector.broadcast %cst_19 : f32 to vector<128x128xf32>
    %51 = arith.cmpf oeq, %44, %50 : vector<128x128xf32>
    %52 = arith.extui %51 : vector<128x128xi1> to vector<128x128xi32>
    %53 = arith.sitofp %52 : vector<128x128xi32> to vector<128x128xf32>
    %54 = arith.mulf %36, %53 : vector<128x128xf32>
    %cst_20 = arith.constant 0.000000e+00 : f32
    %55 = vector.broadcast %cst_20 : f32 to vector<128x128xf32>
    %56 = vector.extract_strided_slice %10 {offsets = [0, 0], sizes = [128, 1], strides = [1, 1]} : vector<128x8xf32> to vector<128x1xf32>
    %57 = vector.extract_strided_slice %6 {offsets = [0, 0], sizes = [1, 128], strides = [1, 1]} : vector<8x128xf32> to vector<1x128xf32>
    %58 = vector.broadcast %56 : vector<128x1xf32> to vector<128x128xf32>
    %59 = vector.broadcast %57 : vector<1x128xf32> to vector<128x128xf32>
    %60 = arith.subf %58, %59 : vector<128x128xf32>
    %61 = math.absf %60 : vector<128x128xf32>
    %62 = arith.addf %55, %61 : vector<128x128xf32>
    %63 = vector.extract_strided_slice %10 {offsets = [0, 1], sizes = [128, 1], strides = [1, 1]} : vector<128x8xf32> to vector<128x1xf32>
    %64 = vector.extract_strided_slice %6 {offsets = [1, 0], sizes = [1, 128], strides = [1, 1]} : vector<8x128xf32> to vector<1x128xf32>
    %65 = vector.broadcast %63 : vector<128x1xf32> to vector<128x128xf32>
    %66 = vector.broadcast %64 : vector<1x128xf32> to vector<128x128xf32>
    %67 = arith.subf %65, %66 : vector<128x128xf32>
    %68 = math.absf %67 : vector<128x128xf32>
    %69 = arith.addf %62, %68 : vector<128x128xf32>
    %70 = vector.extract_strided_slice %10 {offsets = [0, 2], sizes = [128, 1], strides = [1, 1]} : vector<128x8xf32> to vector<128x1xf32>
    %71 = vector.extract_strided_slice %6 {offsets = [2, 0], sizes = [1, 128], strides = [1, 1]} : vector<8x128xf32> to vector<1x128xf32>
    %72 = vector.broadcast %70 : vector<128x1xf32> to vector<128x128xf32>
    %73 = vector.broadcast %71 : vector<1x128xf32> to vector<128x128xf32>
    %74 = arith.subf %72, %73 : vector<128x128xf32>
    %75 = math.absf %74 : vector<128x128xf32>
    %76 = arith.addf %69, %75 : vector<128x128xf32>
    %77 = vector.extract_strided_slice %10 {offsets = [0, 3], sizes = [128, 1], strides = [1, 1]} : vector<128x8xf32> to vector<128x1xf32>
    %78 = vector.extract_strided_slice %6 {offsets = [3, 0], sizes = [1, 128], strides = [1, 1]} : vector<8x128xf32> to vector<1x128xf32>
    %79 = vector.broadcast %77 : vector<128x1xf32> to vector<128x128xf32>
    %80 = vector.broadcast %78 : vector<1x128xf32> to vector<128x128xf32>
    %81 = arith.subf %79, %80 : vector<128x128xf32>
    %82 = math.absf %81 : vector<128x128xf32>
    %83 = arith.addf %76, %82 : vector<128x128xf32>
    %84 = vector.extract_strided_slice %10 {offsets = [0, 4], sizes = [128, 1], strides = [1, 1]} : vector<128x8xf32> to vector<128x1xf32>
    %85 = vector.extract_strided_slice %6 {offsets = [4, 0], sizes = [1, 128], strides = [1, 1]} : vector<8x128xf32> to vector<1x128xf32>
    %86 = vector.broadcast %84 : vector<128x1xf32> to vector<128x128xf32>
    %87 = vector.broadcast %85 : vector<1x128xf32> to vector<128x128xf32>
    %88 = arith.subf %86, %87 : vector<128x128xf32>
    %89 = math.absf %88 : vector<128x128xf32>
    %90 = arith.addf %83, %89 : vector<128x128xf32>
    %91 = vector.extract_strided_slice %10 {offsets = [0, 5], sizes = [128, 1], strides = [1, 1]} : vector<128x8xf32> to vector<128x1xf32>
    %92 = vector.extract_strided_slice %6 {offsets = [5, 0], sizes = [1, 128], strides = [1, 1]} : vector<8x128xf32> to vector<1x128xf32>
    %93 = vector.broadcast %91 : vector<128x1xf32> to vector<128x128xf32>
    %94 = vector.broadcast %92 : vector<1x128xf32> to vector<128x128xf32>
    %95 = arith.subf %93, %94 : vector<128x128xf32>
    %96 = math.absf %95 : vector<128x128xf32>
    %97 = arith.addf %90, %96 : vector<128x128xf32>
    %98 = vector.extract_strided_slice %10 {offsets = [0, 6], sizes = [128, 1], strides = [1, 1]} : vector<128x8xf32> to vector<128x1xf32>
    %99 = vector.extract_strided_slice %6 {offsets = [6, 0], sizes = [1, 128], strides = [1, 1]} : vector<8x128xf32> to vector<1x128xf32>
    %100 = vector.broadcast %98 : vector<128x1xf32> to vector<128x128xf32>
    %101 = vector.broadcast %99 : vector<1x128xf32> to vector<128x128xf32>
    %102 = arith.subf %100, %101 : vector<128x128xf32>
    %103 = math.absf %102 : vector<128x128xf32>
    %104 = arith.addf %97, %103 : vector<128x128xf32>
    %105 = vector.extract_strided_slice %10 {offsets = [0, 7], sizes = [128, 1], strides = [1, 1]} : vector<128x8xf32> to vector<128x1xf32>
    %106 = vector.extract_strided_slice %6 {offsets = [7, 0], sizes = [1, 128], strides = [1, 1]} : vector<8x128xf32> to vector<1x128xf32>
    %107 = vector.broadcast %105 : vector<128x1xf32> to vector<128x128xf32>
    %108 = vector.broadcast %106 : vector<1x128xf32> to vector<128x128xf32>
    %109 = arith.subf %107, %108 : vector<128x128xf32>
    %110 = math.absf %109 : vector<128x128xf32>
    %111 = arith.addf %104, %110 : vector<128x128xf32>
    %c0_21 = arith.constant 0 : index
    %c0_22 = arith.constant 0 : index
    %112 = vector.load %arg10[%c0_21, %c0_22] : memref<1x128xf32, #tpu.memory_space<vmem>>, vector<1x128xf32>
    %113 = arith.mulf %49, %111 : vector<128x128xf32>
    %cst_23 = arith.constant dense<0.000000e+00> : vector<128xf32>
    %114 = vector.multi_reduction <add>, %113, %cst_23 [0] : vector<128x128xf32> to vector<128xf32>
    %115 = vector.shape_cast %114 : vector<128xf32> to vector<1x128xf32>
    %116 = arith.addf %112, %115 : vector<1x128xf32>
    %c0_24 = arith.constant 0 : index
    %c0_25 = arith.constant 0 : index
    %117 = vector.load %arg10[%c0_24, %c0_25] : memref<1x128xf32, #tpu.memory_space<vmem>>, vector<1x128xf32>
    tpu.vector_store %arg10[%c0_24, %c0_25], %116 {strides = array<i32>} : memref<1x128xf32, #tpu.memory_space<vmem>>, vector<1x128xf32>,
    %c0_26 = arith.constant 0 : index
    %c0_27 = arith.constant 0 : index
    %118 = vector.load %arg11[%c0_26, %c0_27] : memref<1x128xf32, #tpu.memory_space<vmem>>, vector<1x128xf32>
    %119 = arith.mulf %54, %111 : vector<128x128xf32>
    %cst_28 = arith.constant dense<0.000000e+00> : vector<128xf32>
    %120 = vector.multi_reduction <add>, %119, %cst_28 [0] : vector<128x128xf32> to vector<128xf32>
    %121 = vector.shape_cast %120 : vector<128xf32> to vector<1x128xf32>
    %122 = arith.addf %118, %121 : vector<1x128xf32>
    %c0_29 = arith.constant 0 : index
    %c0_30 = arith.constant 0 : index
    %123 = vector.load %arg11[%c0_29, %c0_30] : memref<1x128xf32, #tpu.memory_space<vmem>>, vector<1x128xf32>
    tpu.vector_store %arg11[%c0_29, %c0_30], %122 {strides = array<i32>} : memref<1x128xf32, #tpu.memory_space<vmem>>, vector<1x128xf32>,
    %c0_31 = arith.constant 0 : index
    %c0_32 = arith.constant 0 : index
    %124 = vector.load %arg9[%c0_31, %c0_32] : memref<1x128xf32, #tpu.memory_space<vmem>>, vector<1x128xf32>
    %cst_33 = arith.constant dense<0.000000e+00> : vector<128xf32>
    %125 = vector.multi_reduction <add>, %36, %cst_33 [0] : vector<128x128xf32> to vector<128xf32>
    %126 = vector.shape_cast %125 : vector<128xf32> to vector<1x128xf32>
    %127 = arith.addf %124, %126 : vector<1x128xf32>
    %c0_34 = arith.constant 0 : index
    %c0_35 = arith.constant 0 : index
    %128 = vector.load %arg9[%c0_34, %c0_35] : memref<1x128xf32, #tpu.memory_space<vmem>>, vector<1x128xf32>
    tpu.vector_store %arg9[%c0_34, %c0_35], %127 {strides = array<i32>} : memref<1x128xf32, #tpu.memory_space<vmem>>, vector<1x128xf32>,
    %c1_i32 = arith.constant 1 : i32
    %129 = arith.cmpi eq, %arg2, %c1_i32 : i32
    %130 = arith.extui %129 : i1 to i32
    %c0_i32_36 = arith.constant 0 : i32
    %131 = arith.cmpi ne, %130, %c0_i32_36 : i32
    scf.if %131 {
      %c0_37 = arith.constant 0 : index
      %c0_38 = arith.constant 0 : index
      %132 = vector.load %arg9[%c0_37, %c0_38] : memref<1x128xf32, #tpu.memory_space<vmem>>, vector<1x128xf32>
      %cst_39 = arith.constant 1.600000e+01 : f32
      %133 = vector.broadcast %cst_39 : f32 to vector<1x128xf32>
      %134 = arith.minimumf %132, %133 : vector<1x128xf32>
      %c0_40 = arith.constant 0 : index
      %c0_41 = arith.constant 0 : index
      %135 = vector.load %arg10[%c0_40, %c0_41] : memref<1x128xf32, #tpu.memory_space<vmem>>, vector<1x128xf32>
      %c0_42 = arith.constant 0 : index
      %c0_43 = arith.constant 0 : index
      %136 = vector.load %arg11[%c0_42, %c0_43] : memref<1x128xf32, #tpu.memory_space<vmem>>, vector<1x128xf32>
      %cst_44 = arith.constant 1.600000e+01 : f32
      %137 = vector.broadcast %cst_44 : f32 to vector<1x128xf32>
      %138 = arith.subf %137, %134 : vector<1x128xf32>
      %139 = arith.mulf %136, %138 : vector<1x128xf32>
      %140 = arith.addf %135, %139 : vector<1x128xf32>
      %cst_45 = arith.constant 6.250000e-02 : f32
      %141 = vector.broadcast %cst_45 : f32 to vector<1x128xf32>
      %142 = arith.mulf %140, %141 : vector<1x128xf32>
      %143 = vector.shape_cast %142 : vector<1x128xf32> to vector<1x1x128xf32>
      %c0_46 = arith.constant 0 : index
      %c0_47 = arith.constant 0 : index
      %c0_48 = arith.constant 0 : index
      %144 = vector.load %arg8[%c0_46, %c0_47, %c0_48] : memref<1x1x128xf32, #tpu.memory_space<vmem>>, vector<1x1x128xf32>
      tpu.vector_store %arg8[%c0_46, %c0_47, %c0_48], %143 {strides = array<i32>} : memref<1x1x128xf32, #tpu.memory_space<vmem>>, vector<1x1x128xf32>,
    } else {
    }
    return
  }
  func.func @transform_0(%arg0: i32, %arg1: i32, %arg2: i32) -> (i32, i32) {
    %c0_i32 = arith.constant 0 : i32
    %c0_i32_0 = arith.constant 0 : i32
    %c0_i32_1 = arith.constant 0 : i32
    return %c0_i32, %c0_i32_0 : i32, i32
  }
  func.func @transform_1(%arg0: i32, %arg1: i32, %arg2: i32) -> (i32, i32, i32) {
    %c0_i32 = arith.constant 0 : i32
    %c0_i32_0 = arith.constant 0 : i32
    return %arg0, %c0_i32, %arg1 : i32, i32, i32
  }
  func.func @transform_2(%arg0: i32, %arg1: i32, %arg2: i32) -> (i32, i32, i32) {
    %c0_i32 = arith.constant 0 : i32
    %c0_i32_0 = arith.constant 0 : i32
    return %arg0, %c0_i32, %arg1 : i32, i32, i32
  }
  func.func @transform_3(%arg0: i32, %arg1: i32, %arg2: i32) -> (i32, i32, i32) {
    %c0_i32 = arith.constant 0 : i32
    %c0_i32_0 = arith.constant 0 : i32
    return %arg0, %arg2, %c0_i32 : i32, i32, i32
  }
  func.func @transform_4(%arg0: i32, %arg1: i32, %arg2: i32) -> (i32, i32, i32) {
    %c0_i32 = arith.constant 0 : i32
    %c0_i32_0 = arith.constant 0 : i32
    return %arg0, %arg2, %c0_i32 : i32, i32, i32
  }
  func.func @transform_5(%arg0: i32, %arg1: i32, %arg2: i32) -> (i32, i32, i32) {
    %c0_i32 = arith.constant 0 : i32
    %c0_i32_0 = arith.constant 0 : i32
    return %arg0, %c0_i32, %arg1 : i32, i32, i32
  }
}

</mosaic_0001>

<bundles_post_ra>
// kernel: tpu_custom_call.1
= control target key start
LH: loop header
LB: loop body
LE: loop exit
PB: predicated region body
PF: predicated region fallthrough
CT: control target
= control target key end

     0   :  { %10 = vsyncpa [#allocation6], 0  ;;  %s4234_s0 = inlined_call_operand.vmem [shape: bf16[128,128], index: 0, kind: input, shape index: {}]   ;;  %s4235_s1 = inlined_call_operand.vmem [shape: f32[2,3,256], index: 1, kind: input, shape index: {}]   ;;  %s4236_s2 = inlined_call_operand.vmem [shape: f32[2,8,256], index: 2, kind: input, shape index: {}]   ;;  %s4237_s3 = inlined_call_operand.vmem [shape: f32[2,256,3], index: 3, kind: input, shape index: {}]   ;;  %s4238_s4 = inlined_call_operand.vmem [shape: f32[2,256,8], index: 4, kind: input, shape index: {}]   ;;  %s4239_s5 = inlined_call_operand.hbm [shape: f32[2,1,256], index: 5, kind: output, shape index: {}]  }
   0x1   :  { %12 = vsyncpa [#allocation6 + $0x1], 0  ;;  %s2794_s18 = smov 0   ;;  %s2796_s19 = smov 0  }
   0x2   :  { %s2798_s20 = smov 0   ;;  %s2800_s21 = smov 0  }
   0x3   :  { %s2802_s22 = smov 0   ;;  %s2804_s23 = smov 0  }
   0x4   :  { %s2806_s24 = smov 0   ;;  %s2808_s25 = smov 0  }
   0x5   :  { %s2810_s26 = smov 0   ;;  %s2812_s27 = smov 0  }
   0x6 LB: > { %4293 = sst [smem:[#allocation8_spill]] %s2722_s20  ;;  %s2341_s28 = sadd.s32 4294967295, %s2750_s27   ;;  %s2750_s27 = sphi %s2812_s27, %s18_s27   ;;  %s2746_s26 = sphi %s2810_s26, %s4364_s26   ;;  %s2742_s25 = sphi %s2808_s25, %s4363_s25   ;;  %s2738_s24 = sphi %s2806_s24, %s4362_s24   ;;  %s2734_s23 = sphi %s2804_s23, %s4361_s23   ;;  %s2730_s22 = sphi %s2802_s22, %s4360_s22   ;;  %s2726_s21 = sphi %s2800_s21, %s4359_s21   ;;  %s2722_s20 = sphi %s2798_s20, %s4358_s20   ;;  %s2718_s19 = sphi %s2796_s19, %s4366_s19   ;;  %s2714_s18 = sphi %s2794_s18, %s4365_s18  }
   0x7   : > { %4294 = sst [smem:[#allocation9_spill]] %s2738_s24  ;;  %s2342_s29 = sadd.s32 4294967294, %s2750_s27  }
   0x8   : > { %4295 = sst [smem:[#allocation10_spill]] %s2742_s25  ;;  %s30_s30 = sadd.s32 1, %s2738_s24 }
   0x9   : > { %4296 = sst [smem:[#allocation11_spill]] %s2746_s26  ;;  %p31_p0 = scmp.ge.s32.totalorder %s30_s30, 2 }
   0xa   : > { %s33_s6 = sadd.s32 1, %s2742_s25  ;;  %s37_s7 = sadd.s32 1, %s2746_s26 }
   0xb   : > { %p189_p1 = scmp.ne.s32.totalorder %s2722_s20, %s2718_s19  ;;  %s4368_s30 = smov (%p31_p0, %s30_s30), 0 }
   0xc   : > { %4297 = sst [smem:[#allocation12_spill]] %s4368_s30  ;;  %s4370_s6 = smov (!%p31_p0, %s33_s6), %s2742_s25 }
   0xd   : > { %p190_p2 = scmp.eq.s32.totalorder %s2341_s28, 7  ;;  %p195_p3 = scmp.ne.s32.totalorder %s2718_s19, %s2714_s18 }
   0xe   : > { %p35_p4 = scmp.ge.s32.totalorder %s4370_s6, 2  ;;  %p196_p5 = scmp.eq.s32.totalorder %s2342_s29, 7 }
   0xf   : > { %p2856_p6 = por %p190_p2, %p189_p1  ;;  %p2345_p8 = scmp.ge.s32.totalorder %s2750_s27, 1 }
  0x10   : > { %s4372_s6 = smov (%p35_p4, %s4370_s6), 0  ;;  %s4374_s7 = smov (!%p35_p4, %s37_s7), %s2746_s26 }
  0x11   : > { %4299 = sst [smem:[#allocation13_spill]] %s4372_s6  ;;  %p2863_p7 = por %p196_p5, %p195_p3 }
  0x12   : > { %p39_p9 = scmp.ge.s32.totalorder %s4374_s7, 2  ;;  %p265_p10 = scmp.lt.s32.totalorder %s2750_s27, 9 }
  0x13   : > { %s4300_s9 = scalar_select %p2863_p7, 1, 0 }
  0x14   : > { %s175_s10 = ssub.s32 %s2742_s25, %s4372_s6  ;;  %s4376_s7 = smov (%p39_p9, %s4374_s7), 0 }
  0x15   : > { %4301 = sst [smem:[#allocation14_spill]] %s4300_s9  ;;  %p266_p11 = pnand %p2345_p8, %p265_p10 }
  0x16   : > { %4302 = sst [smem:[#allocation15_spill]] %s4376_s7  ;;  %s174_s11 = ssub.s32 %s2746_s26, %s4376_s7 }
  0x17   : > { %s176_s12 = sor.u32 %s175_s10, %s174_s11  ;;  %s179_s13 = sadd.s32 1, %s2722_s20 }
  0x18   : > { %p177_p12 = scmp.eq.s32.totalorder %s176_s12, 0  ;;  %269 = sbr.rel (%p266_p11) target bundleno = 621 (0x26d), region = 40 }
  0x1a   : > { %s2877_s14 = scalar_select %p177_p12, %s2722_s20, %s179_s13  }
  0x1c   : > { %4303 = sst [smem:[#allocation16_spill]] %s2877_s14 }
  0x1d   : > { %p321_p13 = scmp.lt.s32.totalorder %s2734_s23, 1  ;;  %p323_p0 = scmp.lt.s32.totalorder %s2730_s22, 1 }
  0x1e   : > { %s2350_s29 = sshll.u32 %s2726_s21, 4  ;;  %p2356_p2 = scmp.ne.s32.totalorder %s2726_s21, 0 }
  0x1f   : > { %s322_s16 = scalar_select %p321_p13, %s2734_s23, 1 }
  0x20   : > { %s324_s17 = scalar_select %p323_p0, %s2730_s22, 1 }
  0x21   : > { %s2346_s28 = sshll.u32 %s322_s16, 1  ;;  %p340_p1 = scmp.lt.s32.totalorder %s2350_s29, 31 }
  0x22   : > { %s326_s10 = sadd.s32 %s2346_s28, %s324_s17  ;;  %s2351_s25 = sshll.u32 %s322_s16, 5 }
  0x23   : > { %s2347_s11 = sshll.u32 %s326_s10, 2  ;;  %s2349_s12 = sshll.u32 %s326_s10, 3 }
  0x24   : > { %s2888_s6 = scalar_lea.vmem %s4235_s1, %s2347_s11  ;;  %s2893_s15 = scalar_lea.vmem %s4236_s2, %s2349_s12 }
  0x25   : > { %s4378_s29 = smov (!%p340_p1, %s2350_s29), 31  ;;  %s4304_s11 = sand.u32 1, %s2718_s19  }
  0x26   : > { %s343_s24 = sadd.s32 %s2351_s25, %s4378_s29  ;;  %s2907_s13 = scalar_lea.vmem [#allocation5], %s4304_s11 }
  0x27   : > { %s2352_s14 = sshll.u32 %s343_s24, 3  ;;  %361 = sbr.rel (%p2356_p2) target bundleno = 47 (0x2f), region = 44 }
  0x28   : > { %s2898_s17 = scalar_lea.vmem %s4237_s3, %s2352_s14  ;;  %s2903_s7 = scalar_lea.vmem %s4238_s4, %s2352_s14 }
  0x2c   : > { %v2752_v0 = vmov 0.0  }
  0x2d   : > { %362 = vst [vmem:[#allocation2] sm:$0x1] %v2752_v0  ;;  %363 = vst [vmem:[#allocation3] sm:$0x1] %v2752_v0 }
  0x2e   : > { %364 = vst [vmem:[#allocation4] sm:$0x1] %v2752_v0 }
  0x2f PF: > { %v369_v1 = vld [vmem:[%s2898_s17 + $0x10] sm:$0xff]  ;;  %v367_v2 = vld [vmem:[%s2898_s17] sm:$0xff]  ;;  %v2753_v3 = vmov 1   ;;  %v2754_v4 = vmov 0   ;;  %v370_v5 = vld [vmem:[%s2898_s17 + $0x18] sm:$0xff]  ;;  %v2755_v13 = vmov 2   ;;  %v479_v60 = vlaneseq }
  0x30   : > { %2598 = vset.pattern.permute.xlu0 %v2753_v3  ;;  %2597 = vset.pattern.permute.xlu1 %v2754_v4  ;;  %v372_v6 = vld [vmem:[%s2898_s17 + $0x28] sm:$0xff]  ;;  %v374_v7 = vld [vmem:[%s2898_s17 + $0x38] sm:$0xff]  ;;  %v371_v14 = vld [vmem:[%s2898_s17 + $0x20] sm:$0xff]  ;;  %p2430_p3 = scmp.ne.s32.totalorder %s2726_s21, 1 }
  0x31   : > { %411 = vperm.xlu1 %2597, %v369_v1   ;;  %532 = vperm.xlu0 %2598, %v367_v2   ;;  %v376_v8 = vld [vmem:[%s2898_s17 + $0x48] sm:$0xff]  ;;  %v378_v9 = vld [vmem:[%s2898_s17 + $0x58] sm:$0xff]  ;;  %v373_v15 = vld [vmem:[%s2898_s17 + $0x30] sm:$0xff]  ;;  %v3072_v63 = vshrl.u32 %v479_v60, 7 }
  0x32   : > { %v380_v10 = vld [vmem:[%s2898_s17 + $0x68] sm:$0xff]  ;;  %v382_v11 = vld [vmem:[%s2898_s17 + $0x78] sm:$0xff]  ;;  %v375_v16 = vld [vmem:[%s2898_s17 + $0x40] sm:$0xff] }
  0x33   : > { %v368_v12 = vld [vmem:[%s2898_s17 + $0x8] sm:$0xff]  ;;  %v377_v17 = vld [vmem:[%s2898_s17 + $0x50] sm:$0xff]  ;;  %v379_v18 = vld [vmem:[%s2898_s17 + $0x60] sm:$0xff]  ;;  %4305 = vst [vmem:[#allocation17_spill] sm:$0xff] %v3072_v63  ;;  %v4249_v0 = vsub.s32 1, %v3072_v63 }
  0x34   : > { %v381_v19 = vld [vmem:[%s2898_s17 + $0x70] sm:$0xff]  ;;  %v2933_v20 = vld [vmem:[%s2903_s7] sm:$0xff]  ;;  %v2937_v21 = vld [vmem:[%s2903_s7 + $0x18] sm:$0xff] }
  0x35   : > { %416 = vperm.xlu1 %2597, %v370_v5   ;;  %544 = vperm.xlu0 %2598, %v370_v5   ;;  %v2941_v22 = vld [vmem:[%s2903_s7 + $0x28] sm:$0xff]  ;;  %v2950_v24 = vld [vmem:[%s2903_s7 + $0x38] sm:$0xff]  ;;  %v2953_v25 = vld [vmem:[%s2903_s7 + $0x10] sm:$0xff] }
  0x36   : > { %v2944_v23 = vld [vmem:[%s2903_s7 + $0x8] sm:$0xff]  ;;  %v2961_v27 = vld [vmem:[%s2903_s7 + $0x20] sm:$0xff]  ;;  %v2966_v28 = vld [vmem:[%s2903_s7 + $0x58] sm:$0xff] }
  0x37   : > { %v2958_v26 = vld [vmem:[%s2903_s7 + $0x48] sm:$0xff]  ;;  %v2969_v29 = vld [vmem:[%s2903_s7 + $0x30] sm:$0xff]  ;;  %v2977_v31 = vld [vmem:[%s2903_s7 + $0x40] sm:$0xff] }
  0x38   : > { %v2974_v30 = vld [vmem:[%s2903_s7 + $0x68] sm:$0xff]  ;;  %v2982_v32 = vld [vmem:[%s2903_s7 + $0x78] sm:$0xff]  ;;  %v2985_v33 = vld [vmem:[%s2903_s7 + $0x50] sm:$0xff] }
  0x39   : > { %426 = vperm.xlu1 %2597, %v372_v6   ;;  %552 = vperm.xlu0 %2598, %v372_v6   ;;  %v2994_v36 = vld [vmem:[%s2903_s7 + $0x60] sm:$0xff]  ;;  %v3004_v39 = vld [vmem:[%s2903_s7 + $0x70] sm:$0xff] }
  0x3a   : > { %v2620_v42 = vld [vmem:[%s4234_s0] sm:$0xff]  }
  0x3b   : > { %v2621_v43 = vld [vmem:[%s4234_s0 + $0x20] sm:$0xff]   ;;  %2467 = vmatprep.mubr.bf16.mxu0 %v2620_v42 }
  0x3c   : > { %2475 = vmatprep.mubr.bf16.mxu1 %v2621_v43 }
  0x3d   : > { %436 = vperm.xlu1 %2597, %v374_v7   ;;  %560 = vperm.xlu0 %2598, %v374_v7  }
  0x41   : > { %446 = vperm.xlu1 %2597, %v376_v8   ;;  %568 = vperm.xlu0 %2598, %v376_v8  }
  0x45   : > { %456 = vperm.xlu1 %2597, %v378_v9   ;;  %576 = vperm.xlu0 %2598, %v378_v9  }
  0x49   : > { %466 = vperm.xlu1 %2597, %v380_v10   ;;  %584 = vperm.xlu0 %2598, %v380_v10  }
  0x4d   : > { %476 = vperm.xlu1 %2597, %v382_v11   ;;  %592 = vperm.xlu0 %2598, %v382_v11  }
  0x51   : > { %2599 = vset.pattern.permute.xlu1 %v2753_v3  ;;  %2601 = vset.pattern.permute.xlu0 %v2755_v13 }
  0x52   : > { %536 = vperm.xlu1 %2599, %v368_v12   ;;  %652 = vperm.xlu0 %2601, %v368_v12  }
  0x56   : > { %540 = vperm.xlu1 %2599, %v369_v1   ;;  %664 = vperm.xlu0 %2601, %v371_v14  }
  0x5a   : > { %548 = vperm.xlu1 %2599, %v371_v14   ;;  %672 = vperm.xlu0 %2601, %v373_v15  }
  0x5e   : > { %556 = vperm.xlu1 %2599, %v373_v15   ;;  %680 = vperm.xlu0 %2601, %v375_v16  }
  0x62   : > { %564 = vperm.xlu1 %2599, %v375_v16   ;;  %688 = vperm.xlu0 %2601, %v377_v17  }
  0x66   : > { %572 = vperm.xlu1 %2599, %v377_v17   ;;  %696 = vperm.xlu0 %2601, %v379_v18  }
  0x6a   : > { %580 = vperm.xlu1 %2599, %v379_v18   ;;  %704 = vperm.xlu0 %2601, %v381_v19  }
  0x6e   : > { %588 = vperm.xlu1 %2599, %v381_v19   ;;  %2602 = vset.pattern.permute.xlu0 %v2754_v4 }
  0x6f   : > { %401 = vperm.xlu0 %2602, %v367_v2  }
  0x72   : > { %2600 = vset.pattern.permute.xlu1 %v2755_v13 }
  0x73   : > { %648 = vperm.xlu1 %2600, %v367_v2   ;;  %406 = vperm.xlu0 %2602, %v368_v12  }
  0x77   : > { %656 = vperm.xlu1 %2600, %v369_v1   ;;  %421 = vperm.xlu0 %2602, %v371_v14  }
  0x7b   : > { %660 = vperm.xlu1 %2600, %v370_v5   ;;  %431 = vperm.xlu0 %2602, %v373_v15   ;;  %v4247_v15 = vsub.s32 2, %v3072_v63 }
  0x7f   : > { %668 = vperm.xlu1 %2600, %v372_v6   ;;  %441 = vperm.xlu0 %2602, %v375_v16  }
  0x83   : > { %676 = vperm.xlu1 %2600, %v374_v7   ;;  %451 = vperm.xlu0 %2602, %v377_v17  }
  0x87   : > { %684 = vperm.xlu1 %2600, %v376_v8   ;;  %461 = vperm.xlu0 %2602, %v379_v18  }
  0x8b   : > { %692 = vperm.xlu1 %2600, %v378_v9   ;;  %471 = vperm.xlu0 %2602, %v381_v19  }
  0x8f   : > { %700 = vperm.xlu1 %2600, %v380_v10   ;;  %1133 = vperm.xlu0 %2602, %v2933_v20  }
  0x93   : > { %708 = vperm.xlu1 %2600, %v382_v11   ;;  %1148 = vperm.xlu0 %2602, %v2937_v21  }
  0x97   : > { %2603 = vset.pattern.permute.xlu1 %v2754_v4  ;;  %1158 = vperm.xlu0 %2602, %v2941_v22   ;;  %v365_v4 = vld [vmem:[%s2888_s6] sm:$0x7] }
  0x98   : > { %1138 = vperm.xlu1 %2603, %v2944_v23   ;;  %v3086_v5 = vrot.slane %v365_v4, %v4249_v0  ;;  %v3126_v43 = vrot.slane %v365_v4, %v4247_v15 }
  0x9b   : > { %1168 = vperm.xlu0 %2602, %v2950_v24  }
  0x9c   : > { %1143 = vperm.xlu1 %2603, %v2953_v25  }
  0x9f   : > { %1178 = vperm.xlu0 %2602, %v2958_v26  }
  0xa0   : > { %1153 = vperm.xlu1 %2603, %v2961_v27  }
  0xa3   : > { %1188 = vperm.xlu0 %2602, %v2966_v28  }
  0xa4   : > { %1163 = vperm.xlu1 %2603, %v2969_v29  }
  0xa7   : > { %1198 = vperm.xlu0 %2602, %v2974_v30  }
  0xa8   : > { %1173 = vperm.xlu1 %2603, %v2977_v31  }
  0xab   : > { %1208 = vperm.xlu0 %2602, %v2982_v32  }
  0xac   : > { %v2988_v34 = vpop.permute.xlu1 %411  ;;  %1183 = vperm.xlu1 %2603, %v2985_v33   ;;  %v2991_v35 = vpop.permute.xlu0 %532 }
  0xad   : > { %v599_v19 = vsub.f32 %v2991_v35, %v3086_v5 }
  0xaf   : > { %2605 = vset.pattern.permute.xlu0 %v2753_v3 }
  0xb0   : > { %v2997_v37 = vpop.permute.xlu1 %416  ;;  %1193 = vperm.xlu1 %2603, %v2994_v36   ;;  %1268 = vperm.xlu0 %2605, %v2944_v23   ;;  %v3001_v38 = vpop.permute.xlu0 %544 }
  0xb1   : > { %v602_v10 = vsub.f32 %v3001_v38, %v3086_v5 }
  0xb3   : > { %v618_v38 = vmul.f32 %v602_v10, %v602_v10 }
  0xb4   : > { %v3006_v40 = vpop.permute.xlu1 %426  ;;  %1203 = vperm.xlu1 %2603, %v3004_v39   ;;  %1280 = vperm.xlu0 %2605, %v2961_v27   ;;  %v3010_v41 = vpop.permute.xlu0 %552 }
  0xb5   : > { %v604_v14 = vsub.f32 %v3010_v41, %v3086_v5 }
  0xb7   : > { %v620_v42 = vmul.f32 %v604_v14, %v604_v14  ;;  %v615_v14 = vmul.f32 %v599_v19, %v599_v19 }
  0xb8   : > { %v3018_v44 = vpop.permute.xlu1 %436  ;;  %2604 = vset.pattern.permute.xlu1 %v2753_v3  ;;  %1288 = vperm.xlu0 %2605, %v2969_v29   ;;  %v3022_v45 = vpop.permute.xlu0 %560  ;;  %v4248_v3 = vsub.s32 0, %v3072_v63 }
  0xb9   : > { %1264 = vperm.xlu1 %2604, %v2933_v20   ;;  %v606_v17 = vsub.f32 %v3022_v45, %v3086_v5 }
  0xba   : > { %v3096_v8 = vrot.slane %v365_v4, %v4248_v3  ;;  %v4250_v3 = vmov 3  }
  0xbc   : > { %v3025_v46 = vpop.permute.xlu1 %446  ;;  %1296 = vperm.xlu0 %2605, %v2977_v31   ;;  %v3028_v47 = vpop.permute.xlu0 %568  ;;  %v486_v9 = vsub.f32 %v2997_v37, %v3096_v8  ;;  %v490_v16 = vsub.f32 %v3018_v44, %v3096_v8  ;;  %v485_v18 = vsub.f32 %v2988_v34, %v3096_v8  ;;  %v622_v34 = vmul.f32 %v606_v17, %v606_v17 }
  0xbd   : > { %1272 = vperm.xlu1 %2604, %v2953_v25   ;;  %v492_v35 = vsub.f32 %v3025_v46, %v3096_v8  ;;  %v608_v10 = vsub.f32 %v3028_v47, %v3086_v5 }
  0xbe   : > { %v502_v37 = vmul.f32 %v486_v9, %v486_v9  ;;  %v506_v45 = vmul.f32 %v490_v16, %v490_v16  ;;  %v501_v9 = vmul.f32 %v485_v18, %v485_v18 }
  0xc0   : > { %v3031_v48 = vpop.permute.xlu1 %456  ;;  %1304 = vperm.xlu0 %2605, %v2985_v33   ;;  %v3034_v49 = vpop.permute.xlu0 %576  ;;  %v3137_v15 = vadd.f32 %v618_v38, %v502_v37  ;;  %v3150_v19 = vadd.f32 %v622_v34, %v506_v45 }
  0xc1   : > { %1276 = vperm.xlu1 %2604, %v2937_v21   ;;  %v610_v47 = vsub.f32 %v3034_v49, %v3086_v5 }
  0xc3   : > { %v626_v63 = vmul.f32 %v610_v47, %v610_v47 }
  0xc4   : > { %v3037_v50 = vpop.permute.xlu1 %466  ;;  %1312 = vperm.xlu0 %2605, %v2994_v36   ;;  %v3040_v51 = vpop.permute.xlu0 %584 }
  0xc5   : > { %1284 = vperm.xlu1 %2604, %v2941_v22   ;;  %v496_v45 = vsub.f32 %v3037_v50, %v3096_v8 }
  0xc8   : > { %v3043_v52 = vpop.permute.xlu1 %476  ;;  %1320 = vperm.xlu0 %2605, %v3004_v39   ;;  %v3046_v53 = vpop.permute.xlu0 %592 }
  0xc9   : > { %1292 = vperm.xlu1 %2604, %v2950_v24  }
  0xcc   : > { %2606 = vset.pattern.permute.xlu0 %v2755_v13 }
  0xcd   : > { %v3050_v54 = vpop.permute.xlu1 %536  ;;  %1300 = vperm.xlu1 %2604, %v2958_v26   ;;  %1380 = vperm.xlu0 %2606, %v2933_v20   ;;  %v3054_v55 = vpop.permute.xlu0 %652 }
  0xce   : > { %v600_v16 = vsub.f32 %v3050_v54, %v3086_v5  ;;  %v508_v54 = vmul.f32 %v492_v35, %v492_v35 }
  0xd1   : > { %v541_v56 = vpop.permute.xlu1 %540  ;;  %1308 = vperm.xlu1 %2604, %v2966_v28   ;;  %1392 = vperm.xlu0 %2606, %v2937_v21   ;;  %v3058_v57 = vpop.permute.xlu0 %664 }
  0xd2   : > { %v601_v4 = vsub.f32 %v541_v56, %v3086_v5  ;;  %v719_v50 = vsub.f32 %v3058_v57, %v3126_v43 }
  0xd5   : > { %v3060_v58 = vpop.permute.xlu1 %548  ;;  %1316 = vperm.xlu1 %2604, %v2974_v30   ;;  %1400 = vperm.xlu0 %2606, %v2941_v22   ;;  %v3064_v59 = vpop.permute.xlu0 %672 }
  0xd6   : > { %v603_v49 = vsub.f32 %v3060_v58, %v3086_v5 }
  0xd8   : > { %v619_v47 = vmul.f32 %v603_v49, %v603_v49 }
  0xd9   : > { %v3066_v61 = vpop.permute.xlu1 %556  ;;  %1324 = vperm.xlu1 %2604, %v2982_v32   ;;  %1408 = vperm.xlu0 %2606, %v2950_v24   ;;  %v3070_v62 = vpop.permute.xlu0 %680 }
  0xdd   : > { %v3075_v1 = vpop.permute.xlu1 %564  ;;  %2607 = vset.pattern.permute.xlu1 %v2755_v13  ;;  %1416 = vperm.xlu0 %2606, %v2958_v26   ;;  %v3079_v2 = vpop.permute.xlu0 %688  ;;  %v488_v13 = vsub.f32 %v3006_v40, %v3096_v8 }
  0xde   : > { %1384 = vperm.xlu1 %2607, %v2944_v23  }
  0xdf   : > { %v504_v41 = vmul.f32 %v488_v13, %v488_v13  ;;  %v494_v13 = vsub.f32 %v3031_v48, %v3096_v8  ;;  %v716_v48 = vsub.f32 %v3054_v55, %v3126_v43  ;;  %v616_v55 = vmul.f32 %v600_v16, %v600_v16 }
  0xe1   : > { %v3088_v6 = vpop.permute.xlu1 %572  ;;  %1424 = vperm.xlu0 %2606, %v2966_v28   ;;  %v3091_v7 = vpop.permute.xlu0 %696  ;;  %v3142_v46 = vadd.f32 %v620_v42, %v504_v41  ;;  %v624_v41 = vmul.f32 %v608_v10, %v608_v10  ;;  %v510_v42 = vmul.f32 %v494_v13, %v494_v13  ;;  %v732_v34 = vmul.f32 %v716_v48, %v716_v48 }
  0xe2   : > { %1388 = vperm.xlu1 %2607, %v2953_v25   ;;  %v605_v48 = vsub.f32 %v3066_v61, %v3086_v5 }
  0xe3   : > { %v3164_v16 = vadd.f32 %v624_v41, %v508_v54  ;;  %v612_v54 = vsub.f32 %v3040_v51, %v3086_v5  ;;  %v723_v51 = vsub.f32 %v3070_v62, %v3126_v43 }
  0xe4   : > { %v621_v49 = vmul.f32 %v605_v48, %v605_v48 }
  0xe5   : > { %v3102_v11 = vpop.permute.xlu1 %580  ;;  %1432 = vperm.xlu0 %2606, %v2974_v30   ;;  %v3105_v12 = vpop.permute.xlu0 %704 }
  0xe6   : > { %1396 = vperm.xlu1 %2607, %v2961_v27  }
  0xe9   : > { %v3121_v40 = vpop.permute.xlu1 %588  ;;  %1440 = vperm.xlu0 %2606, %v2982_v32  }
  0xea   : > { %1404 = vperm.xlu1 %2607, %v2969_v29   ;;  %v402_v44 = vpop.permute.xlu0 %401 }
  0xeb   : > { %v483_v60 = vsub.f32 %v402_v44, %v3096_v8  ;;  %v617_v44 = vmul.f32 %v601_v4, %v601_v4 }
  0xed   : > { %v499_v17 = vmul.f32 %v483_v60, %v483_v60  ;;  %2609 = vset.pattern.permute.xlu0 %v4250_v3 }
  0xee   : > { %1412 = vperm.xlu1 %2607, %v2977_v31   ;;  %v649_v56 = vpop.permute.xlu1 %648  ;;  %1500 = vperm.xlu0 %2609, %v2944_v23   ;;  %v407_v18 = vpop.permute.xlu0 %406 }
  0xef   : > { %v715_v37 = vsub.f32 %v649_v56, %v3126_v43  ;;  %v484_v38 = vsub.f32 %v407_v18, %v3096_v8  ;;  %v631_v60 = vadd.f32 %v615_v14, %v499_v17  ;;  %v633_v17 = vadd.f32 %v617_v44, %v501_v9 }
  0xf0   : > { %v721_v44 = vsub.f32 %v3064_v59, %v3126_v43  ;;  %v4254_v59 = vmov 0.0  }
  0xf1   : > { %v731_v0 = vmul.f32 %v715_v37, %v715_v37  ;;  %v500_v3 = vmul.f32 %v484_v38, %v484_v38 }
  0xf2   : > { %1420 = vperm.xlu1 %2607, %v2985_v33   ;;  %v657_v35 = vpop.permute.xlu1 %656  ;;  %1512 = vperm.xlu0 %2609, %v2961_v27   ;;  %v422_v10 = vpop.permute.xlu0 %421  ;;  %v737_v48 = vmul.f32 %v721_v44, %v721_v44 }
  0xf3   : > { %v3160_v13 = vadd.f32 %v731_v0, %v631_v60  ;;  %v632_v4 = vadd.f32 %v616_v55, %v500_v3  ;;  %v717_v58 = vsub.f32 %v657_v35, %v3126_v43  ;;  %v487_v14 = vsub.f32 %v422_v10, %v3096_v8 }
  0xf4   : > { %v3172_v0 = vadd.f32 %v626_v63, %v510_v42  ;;  %v3174_v3 = vmul.f32 %v496_v45, %v496_v45  ;;  %v735_v42 = vmul.f32 %v719_v50, %v719_v50  ;;  %v607_v55 = vsub.f32 %v3075_v1, %v3086_v5 }
  0xf5   : > { %v733_v56 = vmul.f32 %v717_v58, %v717_v58  ;;  %v503_v18 = vmul.f32 %v487_v14, %v487_v14  ;;  %v3170_v37 = vadd.f32 %v732_v34, %v632_v4  ;;  %vm763_vm0 = vcmp.lt.f32.partialorder %v3160_v13, 0.04  ;;  %v2623_v13 = vld [vmem:[%s4234_s0 + $0x28] sm:$0xff]  }
  0xf6   : > { %1428 = vperm.xlu1 %2607, %v2994_v36   ;;  %v661_v9 = vpop.permute.xlu1 %660  ;;  %1520 = vperm.xlu0 %2609, %v2969_v29   ;;  %v432_v57 = vpop.permute.xlu0 %431  ;;  %v3200_v62 = vsel %vm763_vm0, 1.0, %v4254_v59  ;;  %v3212_v50 = vmul.f32 %v612_v54, %v612_v54  ;;  %v739_v54 = vmul.f32 %v723_v51, %v723_v51  ;;  %v725_v51 = vsub.f32 %v3079_v2, %v3126_v43 }
  0xf7   : > { %v3181_v61 = vadd.f32 %v733_v56, %v633_v17  ;;  %v635_v38 = vadd.f32 %v619_v47, %v503_v18  ;;  %v718_v41 = vsub.f32 %v661_v9, %v3126_v43  ;;  %v489_v63 = vsub.f32 %v432_v57, %v3096_v8  ;;  %4306 = vst [vmem:[#allocation18_spill] sm:$0xff] %v3200_v62 }
  0xf8   : > { %vm4253_vm1 = vcmp.lt.f32.partialorder %v3170_v37, 0.04  ;;  %v3216_v47 = vsub.f32 %v3043_v52, %v3096_v8  ;;  %v609_v18 = vsub.f32 %v3088_v6, %v3086_v5 }
  0xf9   : > { %v734_v60 = vmul.f32 %v718_v41, %v718_v41  ;;  %v505_v45 = vmul.f32 %v489_v63, %v489_v63  ;;  %v3194_v10 = vadd.f32 %v735_v42, %v635_v38  ;;  %vm765_vm2 = vcmp.lt.f32.partialorder %v3181_v61, 0.04 }
  0xfa   : > { %1436 = vperm.xlu1 %2607, %v3004_v39   ;;  %v669_v34 = vpop.permute.xlu1 %668  ;;  %1528 = vperm.xlu0 %2609, %v2977_v31   ;;  %v442_v35 = vpop.permute.xlu0 %441  ;;  %v3205_v1 = vsel %vm4253_vm1, 1.0, %v4254_v59  ;;  %v3225_v57 = vsel %vm765_vm2, 1.0, %v4254_v59  ;;  %v623_v38 = vmul.f32 %v607_v55, %v607_v55  ;;  %v4309_v41 = vmov 3  }
  0xfb   : > { %4307 = vst [vmem:[#allocation19_spill] sm:$0xff] %v3205_v1  ;;  %v3208_v4 = vadd.f32 %v734_v60, %v3137_v15  ;;  %v637_v58 = vadd.f32 %v621_v49, %v505_v45  ;;  %v720_v14 = vsub.f32 %v669_v34, %v3126_v43  ;;  %v491_v17 = vsub.f32 %v442_v35, %v3096_v8 }
  0xfc   : > { %v2156_v56 = vadd.f32 %v3205_v1, %v3200_v62  ;;  %4308 = vst [vmem:[#allocation20_spill] sm:$0xff] %v3225_v57  ;;  %vm767_vm4 = vcmp.lt.f32.partialorder %v3194_v10, 0.04  ;;  %v625_v45 = vmul.f32 %v609_v18, %v609_v18  ;;  %v611_v34 = vsub.f32 %v3102_v11, %v3086_v5 }
  0xfd   : > { %v736_v15 = vmul.f32 %v720_v14, %v720_v14  ;;  %v507_v9 = vmul.f32 %v491_v17, %v491_v17  ;;  %v3229_v42 = vadd.f32 %v737_v48, %v637_v58  ;;  %vm766_vm3 = vcmp.lt.f32.partialorder %v3208_v4, 0.04 }
  0xfe   : > { %2608 = vset.pattern.permute.xlu1 %v4309_v41  ;;  %v677_v52 = vpop.permute.xlu1 %676  ;;  %1536 = vperm.xlu0 %2609, %v2985_v33   ;;  %v452_v63 = vpop.permute.xlu0 %451  ;;  %v3244_v60 = vsel %vm766_vm3, 1.0, %v4254_v59  ;;  %v3255_v2 = vsel %vm767_vm4, 1.0, %v4254_v59 }
  0xff   : > { %v3233_v6 = vadd.f32 %v736_v15, %v3142_v46  ;;  %v722_v44 = vsub.f32 %v677_v52, %v3126_v43  ;;  %v493_v49 = vsub.f32 %v452_v63, %v3096_v8  ;;  %1496 = vperm.xlu1 %2608, %v2933_v20   ;;  %v639_v55 = vadd.f32 %v623_v38, %v507_v9 }
 0x100   : > { %4310 = vst [vmem:[#allocation21_spill] sm:$0xff] %v3244_v60  ;;  %v2157_v46 = vadd.f32 %v3225_v57, %v2156_v56  ;;  %vm769_vm5 = vcmp.lt.f32.partialorder %v3229_v42, 0.04  ;;  %4311 = vst [vmem:[#allocation22_spill] sm:$0xff] %v3255_v2  ;;  %v741_v9 = vmul.f32 %v725_v51, %v725_v51  ;;  %v627_v63 = vmul.f32 %v611_v34, %v611_v34 }
 0x101   : > { %v738_v35 = vmul.f32 %v722_v44, %v722_v44  ;;  %v509_v58 = vmul.f32 %v493_v49, %v493_v49  ;;  %vm768_vm6 = vcmp.lt.f32.partialorder %v3233_v6, 0.04  ;;  %v3264_v38 = vadd.f32 %v739_v54, %v639_v55 }
 0x102   : > { %v685_v14 = vpop.permute.xlu1 %684  ;;  %1544 = vperm.xlu0 %2609, %v2994_v36   ;;  %v462_v17 = vpop.permute.xlu0 %461  ;;  %v2158_v48 = vadd.f32 %v3244_v60, %v2157_v46  ;;  %v3269_v41 = vsel %vm768_vm6, 1.0, %v4254_v59  ;;  %v613_v46 = vsub.f32 %v3121_v40, %v3086_v5  ;;  %v3281_v51 = vsel %vm769_vm5, 1.0, %v4254_v59 }
 0x103   : > { %v3259_v56 = vadd.f32 %v738_v35, %v3150_v19  ;;  %v641_v11 = vadd.f32 %v625_v45, %v509_v58  ;;  %v724_v18 = vsub.f32 %v685_v14, %v3126_v43  ;;  %v495_v15 = vsub.f32 %v462_v17, %v3096_v8  ;;  %1504 = vperm.xlu1 %2608, %v2953_v25  }
 0x104   : > { %4312 = vst [vmem:[#allocation23_spill] sm:$0xff] %v3269_v41  ;;  %v2159_v52 = vadd.f32 %v3255_v2, %v2158_v48  ;;  %v727_v19 = vsub.f32 %v3091_v7, %v3126_v43  ;;  %4313 = vst [vmem:[#allocation24_spill] sm:$0xff] %v3281_v51  ;;  %vm771_vm8 = vcmp.lt.f32.partialorder %v3264_v38, 0.04  ;;  %v2155_v38 = vld [vmem:[#allocation2] sm:$0x1] }
 0x105   : > { %v740_v44 = vmul.f32 %v724_v18, %v724_v18  ;;  %v511_v49 = vmul.f32 %v495_v15, %v495_v15  ;;  %vm770_vm7 = vcmp.lt.f32.partialorder %v3259_v56, 0.04  ;;  %v3290_v35 = vadd.f32 %v741_v9, %v641_v11 }
 0x106   : > { %v693_v45 = vpop.permute.xlu1 %692  ;;  %1552 = vperm.xlu0 %2609, %v3004_v39   ;;  %v472_v54 = vpop.permute.xlu0 %471  ;;  %v2160_v55 = vadd.f32 %v3269_v41, %v2159_v52  ;;  %v3296_v14 = vsel %vm770_vm7, 1.0, %v4254_v59  ;;  %v743_v48 = vmul.f32 %v727_v19, %v727_v19  ;;  %v729_v11 = vsub.f32 %v3105_v12, %v3126_v43 }
 0x107   : > { %v3285_v7 = vadd.f32 %v740_v44, %v3164_v16  ;;  %v726_v34 = vsub.f32 %v693_v45, %v3126_v43  ;;  %v497_v40 = vsub.f32 %v472_v54, %v3096_v8  ;;  %1508 = vperm.xlu1 %2608, %v2937_v21   ;;  %v643_v58 = vadd.f32 %v627_v63, %v511_v49 }
 0x108   : > { %4314 = vst [vmem:[#allocation25_spill] sm:$0xff] %v3296_v14  ;;  %v2161_v17 = vadd.f32 %v3281_v51, %v2160_v55  ;;  %v614_v16 = vsub.f32 %v3046_v53, %v3086_v5  ;;  %v629_v15 = vmul.f32 %v613_v46, %v613_v46  ;;  %v2758_v52 = vmov 4  }
 0x109   : > { %v742_v18 = vmul.f32 %v726_v34, %v726_v34  ;;  %v513_v8 = vmul.f32 %v497_v40, %v497_v40  ;;  %vm772_vm9 = vcmp.lt.f32.partialorder %v3285_v7, 0.04  ;;  %vm773_vm10 = vcmp.lt.f32.partialorder %v3290_v35, 0.04 }
 0x10a   : > { %v701_v9 = vpop.permute.xlu1 %700  ;;  %2610 = vset.pattern.permute.xlu0 %v2758_v52  ;;  %v3304_v63 = vpop.permute.xlu0 %1133  ;;  %v2162_v44 = vadd.f32 %v3296_v14, %v2161_v17  ;;  %v3317_v5 = vsel %vm771_vm8, 1.0, %v4254_v59  ;;  %v759_v19 = vadd.f32 %v743_v48, %v643_v58  ;;  %v644_v45 = vadd.f32 %v3212_v50, %v3174_v3 }
 0x10b   : > { %v3309_v49 = vadd.f32 %v742_v18, %v3172_v0  ;;  %v728_v53 = vsub.f32 %v701_v9, %v3126_v43  ;;  %1516 = vperm.xlu1 %2608, %v2941_v22   ;;  %4315 = vst [vmem:[#allocation26_spill] sm:$0xff] %v3317_v5  ;;  %v645_v12 = vadd.f32 %v629_v15, %v513_v8  ;;  %v3323_v0 = vsel %vm772_vm9, 1.0, %v4254_v59 }
 0x10c   : > { %1612 = vperm.xlu0 %2610, %v2933_v20   ;;  %4316 = vst [vmem:[#allocation27_spill] sm:$0xff] %v3323_v0  ;;  %v2163_v46 = vadd.f32 %v3317_v5, %v2162_v44  ;;  %v514_v54 = vmul.f32 %v3216_v47, %v3216_v47  ;;  %v630_v55 = vmul.f32 %v614_v16, %v614_v16  ;;  %v3339_v3 = vsel %vm773_vm10, 1.0, %v4254_v59 }
 0x10d   : > { %v744_v34 = vmul.f32 %v728_v53, %v728_v53  ;;  %v745_v40 = vmul.f32 %v729_v11, %v729_v11  ;;  %vm774_vm11 = vcmp.lt.f32.partialorder %v3309_v49, 0.04  ;;  %4317 = vst [vmem:[#allocation28_spill] sm:$0xff] %v3339_v3  ;;  %vm775_vm12 = vcmp.lt.f32.partialorder %v759_v19, 0.04 }
 0x10e   : > { %v709_v17 = vpop.permute.xlu1 %708  ;;  %v3330_v18 = vpop.permute.xlu0 %1148  ;;  %v2164_v58 = vadd.f32 %v3323_v0, %v2163_v46  ;;  %v3345_v47 = vsel %vm774_vm11, 1.0, %v4254_v59  ;;  %v646_v11 = vadd.f32 %v630_v55, %v514_v54  ;;  %v4331_v5 = vmov 6  }
 0x10f   : > { %v760_v48 = vadd.f32 %v744_v34, %v644_v45  ;;  %v730_v8 = vsub.f32 %v709_v17, %v3126_v43  ;;  %1524 = vperm.xlu1 %2608, %v2950_v24   ;;  %v761_v50 = vadd.f32 %v745_v40, %v645_v12  ;;  %4318 = vst [vmem:[#allocation29_spill] sm:$0xff] %v3345_v47  ;;  %v3356_v12 = vsel %vm775_vm12, 1.0, %v4254_v59 }
 0x110   : > { %1624 = vperm.xlu0 %2610, %v2937_v21   ;;  %v2165_v16 = vadd.f32 %v3339_v3, %v2164_v58  ;;  %4319 = vst [vmem:[#allocation30_spill] sm:$0xff] %v3356_v12  ;;  %v2759_v58 = vmov 1.0|1.0  }
 0x111   : > { %v746_v43 = vmul.f32 %v730_v8, %v730_v8  ;;  %vm776_vm13 = vcmp.lt.f32.partialorder %v760_v48, 0.04  ;;  %vm777_vm14 = vcmp.lt.f32.partialorder %v761_v50, 0.04 }
 0x112   : > { %v3348_v15 = vpop.permute.xlu0 %1158  ;;  %v2166_v9 = vadd.f32 %v3345_v47, %v2165_v16  ;;  %v3360_v46 = vsel %vm776_vm13, 1.0, %v4254_v59  ;;  %v3371_v40 = vsel %vm777_vm14, 1.0, %v4254_v59 }
 0x113   : > { %v762_v44 = vadd.f32 %v746_v43, %v646_v11  ;;  %1532 = vperm.xlu1 %2608, %v2958_v26   ;;  %v3352_v53 = vpop.permute.xlu1 %1138  ;;  %4320 = vst [vmem:[#allocation31_spill] sm:$0xff] %v3360_v46  ;;  %4322 = vst [vmem:[#allocation33_spill] sm:$0xff] %v3371_v40 }
 0x114   : > { %1632 = vperm.xlu0 %2610, %v2941_v22   ;;  %v2167_v45 = vadd.f32 %v3356_v12, %v2166_v9  ;;  %v3565_v12 = vld [vmem:[%s2893_s15] sm:$0xff] }
 0x115   : > { %vm778_vm15 = vcmp.lt.f32.partialorder %v762_v44, 0.04 }
 0x116   : > { %v3364_v54 = vpop.permute.xlu0 %1168  ;;  %vm2381_vm1 = vmpackc.low %vm778_vm15, %vm777_vm14  ;;  %v2168_v55 = vadd.f32 %v3360_v46, %v2167_v45  ;;  %v3374_v17 = vsel %vm778_vm15, 1.0, %v4254_v59 }
 0x117   : > { %1540 = vperm.xlu1 %2608, %v2966_v28   ;;  %v3368_v34 = vpop.permute.xlu1 %1143  ;;  %4323 = vst [vmem:[#allocation34_spill] sm:$0xff] %v3374_v17  ;;  %2451 = vmatprep.subr.msk.bf16.mxu0 %vm2381_vm1, %v2759_v58  ;;  %vm2383_vm14 = vmpackc.low %vm776_vm13, %vm775_vm12 }
 0x118   : > { %4321 = vst [vmem:[#allocation32_spill] sm:$0xff] %v3368_v34  ;;  %1640 = vperm.xlu0 %2610, %v2950_v24   ;;  %2483 = vmatprep.subr.msk.bf16.mxu1 %vm2381_vm1, %v2759_v58  ;;  %v2169_v8 = vadd.f32 %v3371_v40, %v2168_v55  ;;  %v4266_v40 = vmov 7  }
 0x119   : > { %2452 = vmatpush3.bf16.msk.msra.mxu0 %vm2381_vm1, %v2759_v58  ;;  %2491 = vmatpush3.bf16.msk.msra.mxu1 %vm2381_vm1, %v2759_v58  ;;  %vm2385_vm1 = vmpackc.low %vm774_vm11, %vm773_vm10 }
 0x11a   : > { %2453 = vmatprep.subr.msk.bf16.mxu0 %vm2383_vm14, %v2759_v58  ;;  %2484 = vmatprep.subr.msk.bf16.mxu1 %vm2383_vm14, %v2759_v58  ;;  %v3386_v50 = vpop.permute.xlu0 %1178  ;;  %v2170_v16 = vadd.f32 %v3374_v17, %v2169_v8  ;;  %vm2387_vm10 = vmpackc.low %vm772_vm9, %vm771_vm8 }
 0x11b   : > { %1548 = vperm.xlu1 %2608, %v2974_v30   ;;  %v3390_v11 = vpop.permute.xlu1 %1153  ;;  %vm2389_vm8 = vmpackc.low %vm770_vm7, %vm769_vm5 }
 0x11c   : > { %1648 = vperm.xlu0 %2610, %v2958_v26   ;;  %v2171_v43 = vrot.slane %v2170_v16, 4  ;;  %vm2391_vm5 = vmpackc.low %vm768_vm6, %vm767_vm4 }
 0x11d   : > { %2454 = vmatpush3.bf16.msk.msra.mxu0 %vm2383_vm14, %v2759_v58  ;;  %2492 = vmatpush3.bf16.msk.msra.mxu1 %vm2383_vm14, %v2759_v58  ;;  %vm2393_vm4 = vmpackc.low %vm766_vm3, %vm765_vm2  ;;  %vm4325_vm2 = vcmp.lt.f32.partialorder %v3170_v37, 0.04  ;;  %v2624_v37 = vld [vmem:[%s4234_s0 + $0x10] sm:$0xff]  }
 0x11e   : > { %2455 = vmatprep.subr.msk.bf16.mxu0 %vm2385_vm1, %v2759_v58  ;;  %2485 = vmatprep.subr.msk.bf16.mxu1 %vm2385_vm1, %v2759_v58  ;;  %v3401_v19 = vpop.permute.xlu0 %1188  ;;  %v2172_v48 = vadd.f32 %v2171_v43, %v2170_v16  ;;  %v3434_v16 = vld [vmem:[#allocation2] ss:$0 sm:$0xff]  ;;  %vm2395_vm3 = vmpackc.low %vm4325_vm2, %vm763_vm0 }
 0x11f   : > { %1556 = vperm.xlu1 %2608, %v2982_v32   ;;  %v3404_v9 = vpop.permute.xlu1 %1163  ;;  %4324 = vst [vmem:[#allocation35_spill] sm:$0xff] %v3434_v16 }
 0x120   : > { %1656 = vperm.xlu0 %2610, %v2966_v28   ;;  %v2173_v44 = vrot.slane %v2172_v48, 2 }
 0x121   : > { %2456 = vmatpush3.bf16.msk.msra.mxu0 %vm2385_vm1, %v2759_v58  ;;  %2493 = vmatpush3.bf16.msk.msra.mxu1 %vm2385_vm1, %v2759_v58 }
 0x122   : > { %2457 = vmatprep.subr.msk.bf16.mxu0 %vm2387_vm10, %v2759_v58  ;;  %2486 = vmatprep.subr.msk.bf16.mxu1 %vm2387_vm10, %v2759_v58  ;;  %v3415_v35 = vpop.permute.xlu0 %1198  ;;  %v2174_v49 = vadd.f32 %v2173_v44, %v2172_v48  ;;  %v2760_v48 = vmov 5   ;;  %v2622_v44 = vld [vmem:[%s4234_s0 + $0x8] sm:$0xff]  }
 0x123   : > { %2611 = vset.pattern.permute.xlu1 %v2758_v52  ;;  %v3418_v45 = vpop.permute.xlu1 %1173 }
 0x124   : > { %1664 = vperm.xlu0 %2610, %v2974_v30   ;;  %1616 = vperm.xlu1 %2611, %v2944_v23   ;;  %v2175_v55 = vrot.slane %v2174_v49, 1 }
 0x125   : > { %2458 = vmatpush3.bf16.msk.msra.mxu0 %vm2387_vm10, %v2759_v58  ;;  %2494 = vmatpush3.bf16.msk.msra.mxu1 %vm2387_vm10, %v2759_v58 }
 0x126   : > { %2459 = vmatprep.subr.msk.bf16.mxu0 %vm2389_vm8, %v2759_v58  ;;  %2487 = vmatprep.subr.msk.bf16.mxu1 %vm2389_vm8, %v2759_v58  ;;  %v3430_v7 = vpop.permute.xlu0 %1208  ;;  %v2176_v52 = vadd.f32 %v2175_v55, %v2174_v49  ;;  %v2625_v49 = vld [vmem:[%s4234_s0 + $0x30] sm:$0xff]  }
 0x127   : > { %v3432_v8 = vpop.permute.xlu1 %1183 }
 0x128   : > { %1672 = vperm.xlu0 %2610, %v2982_v32   ;;  %1620 = vperm.xlu1 %2611, %v2953_v25   ;;  %v2177_v42 = vadd.f32 %v2176_v52, %v2155_v38 }
 0x129   : > { %2460 = vmatpush3.bf16.msk.msra.mxu0 %vm2389_vm8, %v2759_v58  ;;  %2495 = vmatpush3.bf16.msk.msra.mxu1 %vm2389_vm8, %v2759_v58 }
 0x12a   : > { %2461 = vmatprep.subr.msk.bf16.mxu0 %vm2391_vm5, %v2759_v58  ;;  %2488 = vmatprep.subr.msk.bf16.mxu1 %vm2391_vm5, %v2759_v58  ;;  %2178 = vst [vmem:[#allocation2] sm:$0x1] %v2177_v42  ;;  %v2626_v42 = vld [vmem:[%s4234_s0 + $0x18] sm:$0xff]  }
 0x12b   : > { %v3446_v56 = vpop.permute.xlu1 %1193  ;;  %v3448_v43 = vpop.permute.xlu0 %1268 }
 0x12c   : > { %2613 = vset.pattern.permute.xlu0 %v2760_v48  ;;  %1628 = vperm.xlu1 %2611, %v2961_v27  }
 0x12d   : > { %1732 = vperm.xlu0 %2613, %v2944_v23   ;;  %2462 = vmatpush3.bf16.msk.msra.mxu0 %vm2391_vm5, %v2759_v58 }
 0x12e   : > { %2496 = vmatpush3.bf16.msk.msra.mxu1 %vm2391_vm5, %v2759_v58  ;;  %2463 = vmatprep.subr.msk.bf16.mxu0 %vm2393_vm4, %v2759_v58 }
 0x12f   : > { %2489 = vmatprep.subr.msk.bf16.mxu1 %vm2393_vm4, %v2759_v58  ;;  %v3460_v10 = vpop.permute.xlu1 %1203  ;;  %v3462_v6 = vpop.permute.xlu0 %1280 }
 0x130   : > { %1636 = vperm.xlu1 %2611, %v2969_v29  }
 0x131   : > { %1744 = vperm.xlu0 %2613, %v2961_v27   ;;  %2464 = vmatpush3.bf16.msk.msra.mxu0 %vm2393_vm4, %v2759_v58 }
 0x132   : > { %2497 = vmatpush3.bf16.msk.msra.mxu1 %vm2393_vm4, %v2759_v58  ;;  %2465 = vmatprep.subr.msk.bf16.mxu0 %vm2395_vm3, %v2759_v58 }
 0x133   : > { %2490 = vmatprep.subr.msk.bf16.mxu1 %vm2395_vm3, %v2759_v58  ;;  %v3474_v61 = vpop.permute.xlu0 %1288 }
 0x134   : > { %1644 = vperm.xlu1 %2611, %v2977_v31   ;;  %v3477_v4 = vpop.permute.xlu1 %1264 }
 0x135   : > { %1752 = vperm.xlu0 %2613, %v2969_v29   ;;  %2466 = vmatpush3.bf16.msk.msra.mxu0 %vm2395_vm3, %v2759_v58 }
 0x136   : > { %2498 = vmatpush3.bf16.msk.msra.mxu1 %vm2395_vm3, %v2759_v58 }
 0x137   : > { %v3494_v55 = vpop.permute.xlu0 %1296 }
 0x138   : > { %2468 = vmatmul.mubr.bf16.vlgmr.msra.gmra.mxu0 %v2622_v44  ;;  %1652 = vperm.xlu1 %2611, %v2985_v33   ;;  %v3497_v38 = vpop.permute.xlu1 %1272  ;;  %v2627_v44 = vld [vmem:[%s4234_s0 + $0x38] sm:$0xff]  }
 0x139   : > { %2476 = vmatmul.mubr.bf16.vlgmr.msra.gmra.mxu1 %v2623_v13  ;;  %1760 = vperm.xlu0 %2613, %v2977_v31  }
 0x13a   : > { %2471 = vmatprep.mubr.bf16.mxu0 %v2624_v37  ;;  %2479 = vmatprep.mubr.bf16.mxu1 %v2625_v49 }
 0x13b   : > { %v3500_v58 = vpop.permute.xlu0 %1304 }
 0x13c   : > { %1660 = vperm.xlu1 %2611, %v2994_v36   ;;  %v3503_v52 = vpop.permute.xlu1 %1276 }
 0x13d   : > { %1768 = vperm.xlu0 %2613, %v2985_v33  }
 0x13f   : > { %v3512_v13 = vpop.permute.xlu0 %1312 }
 0x140   : > { %2472 = vmatmul.mubr.bf16.gmra.mxu0 %v2626_v42  ;;  %1668 = vperm.xlu1 %2611, %v3004_v39   ;;  %v3515_v37 = vpop.permute.xlu1 %1284  ;;  %v4260_v42 = vmov 6  }
 0x141   : > { %2480 = vmatmul.mubr.bf16.gmra.mxu1 %v2627_v44  ;;  %1776 = vperm.xlu0 %2613, %v2994_v36  }
 0x143   : > { %v3518_v49 = vpop.permute.xlu0 %1320 }
 0x144   : > { %2612 = vset.pattern.permute.xlu1 %v2760_v48  ;;  %v3520_v59 = vpop.permute.xlu1 %1292 }
 0x145   : > { %1784 = vperm.xlu0 %2613, %v3004_v39   ;;  %1728 = vperm.xlu1 %2612, %v2933_v20  }
 0x148   : > { %v3524_v33 = vpop.permute.xlu1 %1300  ;;  %v3526_v17 = vpop.permute.xlu0 %1380 }
 0x149   : > { %2614 = vset.pattern.permute.xlu0 %v4260_v42  ;;  %1736 = vperm.xlu1 %2612, %v2953_v25  }
 0x14a   : > { %1844 = vperm.xlu0 %2614, %v2933_v20  }
 0x14c   : > { %v3531_v36 = vpop.permute.xlu1 %1308  ;;  %v3533_v48 = vpop.permute.xlu0 %1392 }
 0x14d   : > { %1740 = vperm.xlu1 %2612, %v2937_v21  }
 0x14e   : > { %1856 = vperm.xlu0 %2614, %v2937_v21  }
 0x150   : > { %v3537_v39 = vpop.permute.xlu1 %1316  ;;  %v3539_v44 = vpop.permute.xlu0 %1400 }
 0x151   : > { %1748 = vperm.xlu1 %2612, %v2941_v22  }
 0x152   : > { %2617 = vset.pattern.permute.xlu0 %v4266_v40 }
 0x153   : > { %1964 = vperm.xlu0 %2617, %v2944_v23  }
 0x154   : > { %v3544_v20 = vpop.permute.xlu1 %1324  ;;  %v3546_v25 = vpop.permute.xlu0 %1408 }
 0x155   : > { %1756 = vperm.xlu1 %2612, %v2950_v24  }
 0x157   : > { %1972 = vperm.xlu0 %2617, %v2937_v21  }
 0x158   : > { %v3550_v42 = vpop.permute.xlu0 %1416 }
 0x159   : > { %1764 = vperm.xlu1 %2612, %v2958_v26   ;;  %v3553_v46 = vpop.permute.xlu1 %1384  ;;  %v4327_v26 = vld [vmem:[#allocation17_spill] sm:$0xff] }
 0x15a   : > { %v4328_v2 = vsub.s32 1, %v4327_v26 }
 0x15b   : > { %1976 = vperm.xlu0 %2617, %v2961_v27   ;;  %v4329_v27 = vsub.s32 0, %v4327_v26 }
 0x15c   : > { %v3556_v41 = vpop.permute.xlu0 %1424  ;;  %v3571_v51 = vrot.slane %v3565_v12, %v4328_v2 }
 0x15d   : > { %1772 = vperm.xlu1 %2612, %v2966_v28   ;;  %v3559_v40 = vpop.permute.xlu1 %1388  ;;  %v3577_v28 = vrot.slane %v3565_v12, %v4329_v27  ;;  %v1561_v27 = vsub.s32 3, %v4327_v26 }
 0x15e   : > { %4326 = vst [vmem:[#allocation36_spill] sm:$0xff] %v3559_v40  ;;  %v1335_v2 = vsub.f32 %v3462_v6, %v3571_v51 }
 0x15f   : > { %1980 = vperm.xlu0 %2617, %v2941_v22   ;;  %v1339_v22 = vsub.f32 %v3494_v55, %v3571_v51  ;;  %v1223_v47 = vsub.f32 %v3418_v45, %v3577_v28  ;;  %v1219_v55 = vsub.f32 %v3390_v11, %v3577_v28  ;;  %v1225_v6 = vsub.f32 %v3432_v8, %v3577_v28 }
 0x160   : > { %v3562_v14 = vpop.permute.xlu0 %1432  ;;  %v1351_v57 = vand.u32 2147483647, %v1335_v2  ;;  %v1221_v8 = vsub.f32 %v3404_v9, %v3577_v28 }
 0x161   : > { %1780 = vperm.xlu1 %2612, %v2974_v30   ;;  %v1397_v21 = vpop.permute.xlu1 %1396  ;;  %v1355_v60 = vand.u32 2147483647, %v1339_v22  ;;  %v1239_v11 = vand.u32 2147483647, %v1223_v47 }
 0x163   : > { %1984 = vperm.xlu0 %2617, %v2969_v29   ;;  %v4330_v29 = vsub.s32 2, %v4327_v26  ;;  %v1371_v47 = vadd.f32 %v1355_v60, %v1239_v11  ;;  %v1237_v60 = vand.u32 2147483647, %v1221_v8  ;;  %v3626_v11 = vld [vmem:[%s2903_s7 + $0x48] sm:$0xff] }
 0x164   : > { %v3581_v0 = vpop.permute.xlu0 %1440 }
 0x165   : > { %1788 = vperm.xlu1 %2612, %v2982_v32   ;;  %v1405_v30 = vpop.permute.xlu1 %1404  ;;  %v3591_v1 = vrot.slane %v3565_v12, %v4330_v29  ;;  %v1341_v32 = vsub.f32 %v3500_v58, %v3571_v51  ;;  %v1337_v29 = vsub.f32 %v3474_v61, %v3571_v51  ;;  %v1343_v61 = vsub.f32 %v3512_v13, %v3571_v51 }
 0x167   : > { %1988 = vperm.xlu0 %2617, %v2950_v24   ;;  %v1451_v45 = vsub.f32 %v1397_v21, %v3591_v1  ;;  %v3609_v24 = vrot.slane %v3565_v12, %v1561_v27  ;;  %v1235_v21 = vand.u32 2147483647, %v1219_v55  ;;  %v1357_v22 = vand.u32 2147483647, %v1341_v32 }
 0x168   : > { %v1241_v27 = vand.u32 2147483647, %v1225_v6  ;;  %v1353_v55 = vand.u32 2147483647, %v1337_v29  ;;  %v1345_v6 = vsub.f32 %v3518_v49, %v3571_v51 }
 0x169   : > { %2615 = vset.pattern.permute.xlu1 %v4331_v5  ;;  %v1413_v3 = vpop.permute.xlu1 %1412  ;;  %v3605_v62 = vpop.permute.xlu0 %1500  ;;  %v1467_v2 = vand.u32 2147483647, %v1451_v45  ;;  %v1367_v32 = vadd.f32 %v1351_v57, %v1235_v21 }
 0x16a   : > { %4332 = vst [vmem:[#allocation17_spill] sm:$0xff] %v3605_v62  ;;  %v1455_v58 = vsub.f32 %v1413_v3, %v3591_v1  ;;  %1848 = vperm.xlu1 %2615, %v2944_v23   ;;  %v1453_v3 = vsub.f32 %v1405_v30, %v3591_v1  ;;  %v1227_v23 = vsub.f32 %v3446_v56, %v3577_v28  ;;  %v1359_v30 = vand.u32 2147483647, %v1343_v61 }
 0x16b   : > { %1992 = vperm.xlu0 %2617, %v2977_v31   ;;  %v2628_v31 = vld [vmem:[%s2903_s7 + $0x10] sm:$0xff]  ;;  %v1373_v45 = vadd.f32 %v1357_v22, %v1241_v27  ;;  %v1483_v56 = vadd.f32 %v1467_v2, %v1367_v32  ;;  %v1369_v21 = vadd.f32 %v1353_v55, %v1237_v60  ;;  %v4333_v2 = vmov 7  }
 0x16c   : > { %v1471_v16 = vand.u32 2147483647, %v1455_v58  ;;  %v1469_v57 = vand.u32 2147483647, %v1453_v3  ;;  %v1243_v29 = vand.u32 2147483647, %v1227_v23  ;;  %v1229_v58 = vsub.f32 %v3460_v10, %v3577_v28 }
 0x16d   : > { %v1421_v40 = vpop.permute.xlu1 %1420  ;;  %v1513_v9 = vpop.permute.xlu0 %1512  ;;  %v3639_v23 = vld [vmem:[%s2903_s7 + $0x50] sm:$0xff]  ;;  %v2631_v10 = vld [vmem:[%s2903_s7] sm:$0xff]  ;;  %v1361_v55 = vand.u32 2147483647, %v1345_v6  ;;  %v1215_v60 = vsub.f32 %v3304_v63, %v3577_v28 }
 0x16e   : > { %v1487_v62 = vadd.f32 %v1471_v16, %v1371_v47  ;;  %v1457_v34 = vsub.f32 %v1421_v40, %v3591_v1  ;;  %v1567_v13 = vsub.f32 %v1513_v9, %v3609_v24  ;;  %1852 = vperm.xlu1 %2615, %v2628_v31   ;;  %v1375_v3 = vadd.f32 %v1359_v30, %v1243_v29 }
 0x16f   : > { %1996 = vperm.xlu0 %2617, %v3626_v11   ;;  %v1485_v9 = vadd.f32 %v1469_v57, %v1369_v21  ;;  %v3652_v57 = vld [vmem:[%s2903_s7 + $0x58] sm:$0xff]  ;;  %v1231_v21 = vand.u32 2147483647, %v1215_v60  ;;  %v2634_v60 = vld [vmem:[%s2903_s7 + $0x20] sm:$0xff] }
 0x170   : > { %v1473_v16 = vand.u32 2147483647, %v1457_v34  ;;  %v1583_v40 = vand.u32 2147483647, %v1567_v13  ;;  %v1331_v34 = vsub.f32 %v3477_v4, %v3571_v51 }
 0x171   : > { %v1429_v8 = vpop.permute.xlu1 %1428  ;;  %v1521_v22 = vpop.permute.xlu0 %1520 }
 0x172   : > { %v1489_v61 = vadd.f32 %v1473_v16, %v1373_v45  ;;  %v3631_v47 = vadd.f32 %v1583_v40, %v1483_v56  ;;  %v1459_v49 = vsub.f32 %v1429_v8, %v3591_v1  ;;  %v1569_v27 = vsub.f32 %v1521_v22, %v3609_v24  ;;  %2616 = vset.pattern.permute.xlu1 %v4333_v2 }
 0x173   : > { %2000 = vperm.xlu0 %2617, %v3639_v23   ;;  %1960 = vperm.xlu1 %2616, %v2631_v10   ;;  %v1245_v45 = vand.u32 2147483647, %v1229_v58  ;;  %v1447_v56 = vsub.f32 %v3526_v17, %v3591_v1  ;;  %v1347_v6 = vand.u32 2147483647, %v1331_v34 }
 0x174   : > { %v1475_v32 = vand.u32 2147483647, %v1459_v49  ;;  %v1585_v13 = vand.u32 2147483647, %v1569_v27 }
 0x175   : > { %v1437_v4 = vpop.permute.xlu1 %1436  ;;  %v1529_v30 = vpop.permute.xlu0 %1528  ;;  %v1377_v63 = vadd.f32 %v1361_v55, %v1245_v45  ;;  %v1463_v22 = vand.u32 2147483647, %v1447_v56  ;;  %v1363_v34 = vadd.f32 %v1347_v6, %v1231_v21 }
 0x176   : > { %v1491_v16 = vadd.f32 %v1475_v32, %v1375_v3  ;;  %v3647_v40 = vadd.f32 %v1585_v13, %v1485_v9  ;;  %v1461_v29 = vsub.f32 %v1437_v4, %v3591_v1  ;;  %v1571_v8 = vsub.f32 %v1529_v30, %v3609_v24 }
 0x177   : > { %2004 = vperm.xlu0 %2617, %v3652_v57   ;;  %1968 = vperm.xlu1 %2616, %v2628_v31   ;;  %v1334_v32 = vsub.f32 %v3503_v52, %v3571_v51  ;;  %v3662_v31 = vld [vmem:[%s2903_s7 + $0x60] sm:$0xff]  ;;  %v1479_v45 = vadd.f32 %v1463_v22, %v1363_v34  ;;  %v1450_v52 = vsub.f32 %v3533_v48, %v3591_v1 }
 0x178   : > { %v1477_v58 = vand.u32 2147483647, %v1461_v29  ;;  %v1587_v17 = vand.u32 2147483647, %v1571_v8  ;;  %v1336_v30 = vsub.f32 %v3515_v37, %v3571_v51  ;;  %v1677_v37 = vsub.s32 4, %v4327_v26 }
 0x179   : > { %v1537_v49 = vpop.permute.xlu0 %1536  ;;  %v1350_v6 = vand.u32 2147483647, %v1334_v32  ;;  %v1466_v21 = vand.u32 2147483647, %v1450_v52  ;;  %v1452_v22 = vsub.f32 %v3539_v44, %v3591_v1  ;;  %v1222_v44 = vsub.f32 %v3364_v54, %v3577_v28 }
 0x17a   : > { %v1493_v27 = vadd.f32 %v1477_v58, %v1377_v63  ;;  %v3655_v3 = vadd.f32 %v1587_v17, %v1487_v62  ;;  %v1573_v10 = vsub.f32 %v1537_v49, %v3609_v24  ;;  %v1497_v9 = vpop.permute.xlu1 %1496  ;;  %v1218_v62 = vsub.f32 %v3330_v18, %v3577_v28  ;;  %v3679_v58 = vld [vmem:[%s2903_s7 + $0x68] sm:$0xff] }
 0x17b   : > { %v1563_v13 = vsub.f32 %v1497_v9, %v3609_v24  ;;  %2008 = vperm.xlu0 %2617, %v3662_v31   ;;  %2618 = vset.pattern.permute.xlu1 %v4331_v5  ;;  %v1220_v18 = vsub.f32 %v3348_v15, %v3577_v28  ;;  %v2636_v17 = vld [vmem:[%s2903_s7 + $0x28] sm:$0xff]  ;;  %v3702_v52 = vrot.slane %v3565_v12, %v1677_v37 }
 0x17c   : > { %v1589_v55 = vand.u32 2147483647, %v1573_v10  ;;  %1860 = vperm.xlu1 %2618, %v2634_v60   ;;  %v1352_v10 = vand.u32 2147483647, %v1336_v30  ;;  %v3695_v60 = vld [vmem:[%s2903_s7 + $0x70] sm:$0xff]  ;;  %v1340_v54 = vsub.f32 %v3524_v33, %v3571_v51  ;;  %v1342_v33 = vsub.f32 %v3531_v36, %v3571_v51 }
 0x17d   : > { %v1579_v56 = vand.u32 2147483647, %v1563_v13  ;;  %v1545_v4 = vpop.permute.xlu0 %1544  ;;  %v1338_v13 = vsub.f32 %v3520_v59, %v3571_v51  ;;  %v1454_v59 = vsub.f32 %v3546_v25, %v3591_v1  ;;  %v2639_v25 = vld [vmem:[%s2903_s7 + $0x38] sm:$0xff] }
 0x17e   : > { %v3673_v29 = vadd.f32 %v1589_v55, %v1489_v61  ;;  %v1575_v5 = vsub.f32 %v1545_v4, %v3609_v24  ;;  %v3676_v8 = vpop.permute.xlu1 %1504  ;;  %v1234_v61 = vand.u32 2147483647, %v1218_v62  ;;  %v1236_v62 = vand.u32 2147483647, %v1220_v18 }
 0x17f   : > { %v1595_v63 = vadd.f32 %v1579_v56, %v1479_v45  ;;  %2012 = vperm.xlu0 %2617, %v3679_v58   ;;  %v1468_v4 = vand.u32 2147483647, %v1452_v22 }
 0x180   : > { %v1591_v48 = vand.u32 2147483647, %v1575_v5  ;;  %1864 = vperm.xlu1 %2618, %v2636_v17   ;;  %v1366_v15 = vadd.f32 %v1350_v6, %v1234_v61  ;;  %v1368_v5 = vadd.f32 %v1352_v10, %v1236_v62  ;;  %v1356_v62 = vand.u32 2147483647, %v1340_v54 }
 0x181   : > { %v1553_v49 = vpop.permute.xlu0 %1552 }
 0x182   : > { %v3688_v9 = vadd.f32 %v1591_v48, %v1491_v16  ;;  %v1577_v34 = vsub.f32 %v1553_v49, %v3609_v24  ;;  %v1509_v32 = vpop.permute.xlu1 %1508  ;;  %v2638_v16 = vld [vmem:[%s2903_s7 + $0x30] sm:$0xff]  ;;  %v1482_v56 = vadd.f32 %v1466_v21, %v1366_v15  ;;  %v1354_v48 = vand.u32 2147483647, %v1338_v13 }
 0x183   : > { %v1566_v55 = vsub.f32 %v1509_v32, %v3609_v24  ;;  %2016 = vperm.xlu0 %2617, %v3695_v60   ;;  %v1238_v49 = vand.u32 2147483647, %v1222_v44  ;;  %v1224_v21 = vsub.f32 %v3386_v50, %v3577_v28  ;;  %v1484_v10 = vadd.f32 %v1468_v4, %v1368_v5 }
 0x184   : > { %v1593_v45 = vand.u32 2147483647, %v1577_v34  ;;  %1868 = vperm.xlu1 %2618, %v2638_v16   ;;  %v1456_v34 = vsub.f32 %v3550_v42, %v3591_v1  ;;  %v1458_v5 = vsub.f32 %v3556_v41, %v3591_v1 }
 0x185   : > { %v1582_v30 = vand.u32 2147483647, %v1566_v55  ;;  %v1370_v55 = vadd.f32 %v1354_v48, %v1238_v49  ;;  %v1240_v16 = vand.u32 2147483647, %v1224_v21  ;;  %v1358_v48 = vand.u32 2147483647, %v1342_v33 }
 0x186   : > { %v3706_v6 = vadd.f32 %v1593_v45, %v1493_v27  ;;  %v1517_v18 = vpop.permute.xlu1 %1516  ;;  %v1470_v27 = vand.u32 2147483647, %v1454_v59  ;;  %v2640_v59 = vld [vmem:[%s2903_s7 + $0x40] sm:$0xff]  ;;  %v1472_v36 = vand.u32 2147483647, %v1456_v34  ;;  %v1344_v49 = vsub.f32 %v3537_v39, %v3571_v51 }
 0x187   : > { %v1598_v17 = vadd.f32 %v1582_v30, %v1482_v56  ;;  %v1568_v61 = vsub.f32 %v1517_v18, %v3609_v24  ;;  %v1613_v37 = vpop.permute.xlu0 %1612  ;;  %v1226_v56 = vsub.f32 %v3401_v19, %v3577_v28  ;;  %v1474_v34 = vand.u32 2147483647, %v1458_v5 }
 0x188   : > { %v1679_v22 = vsub.f32 %v1613_v37, %v3702_v52  ;;  %1872 = vperm.xlu1 %2618, %v2639_v25   ;;  %v1486_v30 = vadd.f32 %v1470_v27, %v1370_v55  ;;  %v1372_v37 = vadd.f32 %v1356_v62, %v1240_v16  ;;  %v1228_v25 = vsub.f32 %v3415_v35, %v3577_v28 }
 0x189   : > { %v1584_v32 = vand.u32 2147483647, %v1568_v61  ;;  %v1360_v55 = vand.u32 2147483647, %v1344_v49  ;;  %v1346_v62 = vsub.f32 %v3544_v20, %v3571_v51 }
 0x18a   : > { %v1695_v15 = vand.u32 2147483647, %v1679_v22  ;;  %v1525_v13 = vpop.permute.xlu1 %1524  ;;  %v1242_v22 = vand.u32 2147483647, %v1226_v56  ;;  %v1488_v27 = vadd.f32 %v1472_v36, %v1372_v37  ;;  %v1332_v36 = vsub.f32 %v3448_v43, %v3571_v51 }
 0x18b   : > { %v1600_v44 = vadd.f32 %v1584_v32, %v1484_v10  ;;  %v1570_v50 = vsub.f32 %v1525_v13, %v3609_v24  ;;  %v1625_v45 = vpop.permute.xlu0 %1624  ;;  %v1460_v32 = vsub.f32 %v3562_v14, %v3591_v1  ;;  %v1448_v37 = vsub.f32 %v3553_v46, %v3591_v1 }
 0x18c   : > { %v3722_v4 = vadd.f32 %v1695_v15, %v1595_v63  ;;  %v1682_v42 = vsub.f32 %v1625_v45, %v3702_v52  ;;  %1876 = vperm.xlu1 %2618, %v2640_v59   ;;  %v1374_v33 = vadd.f32 %v1358_v48, %v1242_v22  ;;  %v1244_v45 = vand.u32 2147483647, %v1228_v25  ;;  %v4334_v22 = vld [vmem:[#allocation32_spill] sm:$0xff] }
 0x18d   : > { %v1586_v18 = vand.u32 2147483647, %v1570_v50  ;;  %v1462_v59 = vsub.f32 %v3581_v0, %v3591_v1  ;;  %v1217_v25 = vsub.f32 %v4334_v22, %v3577_v28 }
 0x18e   : > { %v1698_v54 = vand.u32 2147483647, %v1682_v42  ;;  %v1533_v61 = vpop.permute.xlu1 %1532  ;;  %v1490_v56 = vadd.f32 %v1474_v34, %v1374_v33  ;;  %v1476_v42 = vand.u32 2147483647, %v1460_v32 }
 0x18f   : > { %v1602_v19 = vadd.f32 %v1586_v18, %v1486_v30  ;;  %v1572_v63 = vsub.f32 %v1533_v61, %v3609_v24  ;;  %v1633_v21 = vpop.permute.xlu0 %1632  ;;  %v1216_v30 = vsub.f32 %v3352_v53, %v3577_v28  ;;  %v1362_v18 = vand.u32 2147483647, %v1346_v62 }
 0x190   : > { %v3733_v10 = vadd.f32 %v1698_v54, %v1598_v17  ;;  %v1684_v41 = vsub.f32 %v1633_v21, %v3702_v52  ;;  %1880 = vperm.xlu1 %2618, %v3626_v11   ;;  %v1230_v11 = vsub.f32 %v3430_v7, %v3577_v28  ;;  %v1333_v53 = vsub.f32 %v3497_v38, %v3571_v51 }
 0x191   : > { %v1588_v39 = vand.u32 2147483647, %v1572_v63  ;;  %v1478_v63 = vand.u32 2147483647, %v1462_v59  ;;  %v1232_v38 = vand.u32 2147483647, %v1216_v30 }
 0x192   : > { %v1700_v15 = vand.u32 2147483647, %v1684_v41  ;;  %v1541_v13 = vpop.permute.xlu1 %1540  ;;  %v1246_v61 = vand.u32 2147483647, %v1230_v11  ;;  %v1348_v41 = vand.u32 2147483647, %v1332_v36 }
 0x193   : > { %v1604_v35 = vadd.f32 %v1588_v39, %v1488_v27  ;;  %v1574_v17 = vsub.f32 %v1541_v13, %v3609_v24  ;;  %v1641_v50 = vpop.permute.xlu0 %1640  ;;  %v4335_v27 = vld [vmem:[#allocation17_spill] sm:$0xff]  ;;  %v4336_v39 = vld [vmem:[#allocation36_spill] sm:$0xff]  ;;  %v1464_v13 = vand.u32 2147483647, %v1448_v37  ;;  %v1349_v62 = vand.u32 2147483647, %v1333_v53 }
 0x194   : > { %v3744_v16 = vadd.f32 %v1700_v15, %v1600_v44  ;;  %v1686_v14 = vsub.f32 %v1641_v50, %v3702_v52  ;;  %1884 = vperm.xlu1 %2618, %v3639_v23   ;;  %v1376_v44 = vadd.f32 %v1360_v55, %v1244_v45  ;;  %v1564_v34 = vsub.f32 %v4335_v27, %v3609_v24 }
 0x195   : > { %v1590_v20 = vand.u32 2147483647, %v1574_v17  ;;  %v1378_v32 = vadd.f32 %v1362_v18, %v1246_v61  ;;  %v1449_v33 = vsub.f32 %v4336_v39, %v3591_v1  ;;  %v1364_v45 = vadd.f32 %v1348_v41, %v1232_v38 }
 0x196   : > { %v1702_v5 = vand.u32 2147483647, %v1686_v14  ;;  %v1549_v7 = vpop.permute.xlu1 %1548  ;;  %v1492_v43 = vadd.f32 %v1476_v42, %v1376_v44  ;;  %v1580_v11 = vand.u32 2147483647, %v1564_v34  ;;  %v1565_v1 = vsub.f32 %v3676_v8, %v3609_v24  ;;  %v2641_v34 = vld [vmem:[%s2903_s7 + $0x78] sm:$0xff] }
 0x197   : > { %v1606_v48 = vadd.f32 %v1590_v20, %v1490_v56  ;;  %v1576_v54 = vsub.f32 %v1549_v7, %v3609_v24  ;;  %v1649_v23 = vpop.permute.xlu0 %1648  ;;  %v1494_v17 = vadd.f32 %v1478_v63, %v1378_v32  ;;  %v1233_v56 = vand.u32 2147483647, %v1217_v25 }
 0x198   : > { %v3757_v0 = vadd.f32 %v1702_v5, %v1602_v19  ;;  %v1688_v49 = vsub.f32 %v1649_v23, %v3702_v52  ;;  %1888 = vperm.xlu1 %2618, %v3652_v57   ;;  %v1465_v42 = vand.u32 2147483647, %v1449_v33  ;;  %v1581_v18 = vand.u32 2147483647, %v1565_v1 }
 0x199   : > { %v1592_v21 = vand.u32 2147483647, %v1576_v54  ;;  %v1365_v7 = vadd.f32 %v1349_v62, %v1233_v56 }
 0x19a   : > { %v1704_v46 = vand.u32 2147483647, %v1688_v49  ;;  %v1557_v19 = vpop.permute.xlu1 %1556 }
 0x19b   : > { %v1608_v57 = vadd.f32 %v1592_v21, %v1492_v43  ;;  %v1578_v15 = vsub.f32 %v1557_v19, %v3609_v24  ;;  %v1657_v51 = vpop.permute.xlu0 %1656  ;;  %v1481_v8 = vadd.f32 %v1465_v42, %v1365_v7 }
 0x19c   : > { %v3770_v55 = vadd.f32 %v1704_v46, %v1604_v35  ;;  %v1690_v28 = vsub.f32 %v1657_v51, %v3702_v52  ;;  %1892 = vperm.xlu1 %2618, %v3662_v31   ;;  %v1480_v35 = vadd.f32 %v1464_v13, %v1364_v45 }
 0x19d   : > { %v1594_v50 = vand.u32 2147483647, %v1578_v15 }
 0x19e   : > { %v1706_v14 = vand.u32 2147483647, %v1690_v28  ;;  %v1596_v44 = vadd.f32 %v1580_v11, %v1480_v35 }
 0x19f   : > { %v1610_v59 = vadd.f32 %v1594_v50, %v1494_v17  ;;  %v1665_v20 = vpop.permute.xlu0 %1664  ;;  %v1617_v30 = vpop.permute.xlu1 %1616 }
 0x1a0   : > { %v3776_v36 = vadd.f32 %v1706_v14, %v1606_v48  ;;  %v1692_v5 = vsub.f32 %v1665_v20, %v3702_v52  ;;  %v1680_v31 = vsub.f32 %v1617_v30, %v3702_v52  ;;  %1896 = vperm.xlu1 %2618, %v3679_v58   ;;  %v1597_v58 = vadd.f32 %v1581_v18, %v1481_v8 }
 0x1a1   : > { %v1793_v14 = vsub.s32 5, %v4327_v26 }
 0x1a2   : > { %v1708_v54 = vand.u32 2147483647, %v1692_v5  ;;  %v1696_v24 = vand.u32 2147483647, %v1680_v31 }
 0x1a3   : > { %v1673_v23 = vpop.permute.xlu0 %1672  ;;  %v1621_v61 = vpop.permute.xlu1 %1620  ;;  %v3827_v30 = vrot.slane %v3565_v12, %v1793_v14 }
 0x1a4   : > { %v3781_v37 = vadd.f32 %v1708_v54, %v1608_v57  ;;  %v3783_v49 = vadd.f32 %v1696_v24, %v1596_v44  ;;  %v1694_v48 = vsub.f32 %v1673_v23, %v3702_v52  ;;  %v1681_v53 = vsub.f32 %v1621_v61, %v3702_v52  ;;  %1900 = vperm.xlu1 %2618, %v3695_v60  }
 0x1a6   : > { %v1710_v43 = vand.u32 2147483647, %v1694_v48  ;;  %v1697_v63 = vand.u32 2147483647, %v1681_v53 }
 0x1a7   : > { %v1629_v21 = vpop.permute.xlu1 %1628 }
 0x1a8   : > { %v3788_v22 = vadd.f32 %v1710_v43, %v1610_v59  ;;  %v1713_v25 = vadd.f32 %v1697_v63, %v1597_v58  ;;  %v1683_v41 = vsub.f32 %v1629_v21, %v3702_v52  ;;  %v3791_v27 = vpop.permute.xlu0 %1732  ;;  %1904 = vperm.xlu1 %2618, %v2641_v34  }
 0x1aa   : > { %v1699_v46 = vand.u32 2147483647, %v1683_v41 }
 0x1ab   : > { %v1637_v19 = vpop.permute.xlu1 %1636 }
 0x1ac   : > { %v3795_v32 = vadd.f32 %v1699_v46, %v3631_v47  ;;  %v1685_v60 = vsub.f32 %v1637_v19, %v3702_v52  ;;  %v3798_v39 = vpop.permute.xlu0 %1744  ;;  %2619 = vset.pattern.permute.xlu1 %v4333_v2 }
 0x1ad   : > { %2020 = vperm.xlu1 %2619, %v2641_v34  }
 0x1ae   : > { %v1701_v33 = vand.u32 2147483647, %v1685_v60 }
 0x1af   : > { %v1645_v57 = vpop.permute.xlu1 %1644 }
 0x1b0   : > { %v3802_v15 = vadd.f32 %v1701_v33, %v3647_v40  ;;  %v1687_v51 = vsub.f32 %v1645_v57, %v3702_v52  ;;  %v3805_v38 = vpop.permute.xlu0 %1752 }
 0x1b2   : > { %v1703_v13 = vand.u32 2147483647, %v1687_v51 }
 0x1b3   : > { %v1653_v28 = vpop.permute.xlu1 %1652 }
 0x1b4   : > { %v3808_v47 = vadd.f32 %v1703_v13, %v3655_v3  ;;  %v1689_v62 = vsub.f32 %v1653_v28, %v3702_v52  ;;  %v3811_v17 = vpop.permute.xlu0 %1760 }
 0x1b6   : > { %v1705_v2 = vand.u32 2147483647, %v1689_v62 }
 0x1b7   : > { %v1661_v50 = vpop.permute.xlu1 %1660 }
 0x1b8   : > { %v3814_v45 = vadd.f32 %v1705_v2, %v3673_v29  ;;  %v1691_v40 = vsub.f32 %v1661_v50, %v3702_v52  ;;  %v3817_v11 = vpop.permute.xlu0 %1768 }
 0x1ba   : > { %v1707_v1 = vand.u32 2147483647, %v1691_v40 }
 0x1bb   : > { %v1669_v56 = vpop.permute.xlu1 %1668 }
 0x1bc   : > { %v3821_v3 = vadd.f32 %v1707_v1, %v3688_v9  ;;  %v1693_v42 = vsub.f32 %v1669_v56, %v3702_v52  ;;  %v3824_v59 = vpop.permute.xlu0 %1776 }
 0x1be   : > { %v1709_v20 = vand.u32 2147483647, %v1693_v42 }
 0x1c0   : > { %v3830_v29 = vadd.f32 %v1709_v20, %v3706_v6  ;;  %v3832_v35 = vpop.permute.xlu0 %1784  ;;  %v1729_v5 = vpop.permute.xlu1 %1728  ;;  %v1909_v20 = vsub.s32 6, %v4327_v26 }
 0x1c1   : > { %v1795_v31 = vsub.f32 %v1729_v5, %v3827_v30 }
 0x1c3   : > { %v1811_v7 = vand.u32 2147483647, %v1795_v31  ;;  %v2025_v31 = vsub.s32 7, %v4327_v26  ;;  %v1803_v26 = vsub.f32 %v3811_v17, %v3827_v30 }
 0x1c4   : > { %v1737_v44 = vpop.permute.xlu1 %1736 }
 0x1c5   : > { %v3836_v9 = vadd.f32 %v1811_v7, %v3722_v4  ;;  %v1797_v52 = vsub.f32 %v1737_v44, %v3827_v30  ;;  %v3839_v18 = vpop.permute.xlu0 %1844  ;;  %v1796_v44 = vsub.f32 %v3791_v27, %v3827_v30  ;;  %v1805_v27 = vsub.f32 %v3817_v11, %v3827_v30 }
 0x1c6   : > { %v1819_v11 = vand.u32 2147483647, %v1803_v26 }
 0x1c7   : > { %v1813_v54 = vand.u32 2147483647, %v1797_v52 }
 0x1c8   : > { %v1741_v24 = vpop.permute.xlu1 %1740 }
 0x1c9   : > { %v3841_v8 = vadd.f32 %v1813_v54, %v1713_v25  ;;  %v1798_v6 = vsub.f32 %v1741_v24, %v3827_v30  ;;  %v1857_v23 = vpop.permute.xlu0 %1856  ;;  %v1799_v54 = vsub.f32 %v3798_v39, %v3827_v30  ;;  %v1801_v24 = vsub.f32 %v3805_v38, %v3827_v30 }
 0x1ca   : > { %v1812_v39 = vand.u32 2147483647, %v1796_v44  ;;  %v1809_v38 = vsub.f32 %v3832_v35, %v3827_v30 }
 0x1cb   : > { %v1814_v61 = vand.u32 2147483647, %v1798_v6 }
 0x1cc   : > { %v1749_v48 = vpop.permute.xlu1 %1748 }
 0x1cd   : > { %v3845_v53 = vadd.f32 %v1814_v61, %v3733_v10  ;;  %v1800_v58 = vsub.f32 %v1749_v48, %v3827_v30  ;;  %v1807_v61 = vsub.f32 %v3824_v59, %v3827_v30 }
 0x1ce   : > { %v3848_v4 = vpop.permute.xlu0 %1964 }
 0x1cf   : > { %v1816_v43 = vand.u32 2147483647, %v1800_v58  ;;  %v1815_v58 = vand.u32 2147483647, %v1799_v54 }
 0x1d0   : > { %v1757_v63 = vpop.permute.xlu1 %1756 }
 0x1d1   : > { %v3851_v21 = vadd.f32 %v1816_v43, %v3744_v16  ;;  %v1802_v25 = vsub.f32 %v1757_v63, %v3827_v30  ;;  %v1817_v43 = vand.u32 2147483647, %v1801_v24  ;;  %v3916_v35 = vadd.f32 %v1815_v58, %v3795_v32 }
 0x1d2   : > { %v1973_v41 = vpop.permute.xlu0 %1972 }
 0x1d3   : > { %v1818_v34 = vand.u32 2147483647, %v1802_v25 }
 0x1d4   : > { %v1765_v46 = vpop.permute.xlu1 %1764 }
 0x1d5   : > { %v3855_v19 = vadd.f32 %v1818_v34, %v3757_v0  ;;  %v1804_v10 = vsub.f32 %v1765_v46, %v3827_v30  ;;  %v1821_v34 = vand.u32 2147483647, %v1805_v27  ;;  %v1823_v46 = vand.u32 2147483647, %v1807_v61 }
 0x1d6   : > { %v3858_v60 = vpop.permute.xlu0 %1976 }
 0x1d7   : > { %v1820_v33 = vand.u32 2147483647, %v1804_v10  ;;  %v1828_v10 = vadd.f32 %v1812_v39, %v3783_v49 }
 0x1d8   : > { %v1773_v57 = vpop.permute.xlu1 %1772 }
 0x1d9   : > { %v3861_v51 = vadd.f32 %v1820_v33, %v3770_v55  ;;  %v1806_v16 = vsub.f32 %v1773_v57, %v3827_v30  ;;  %v1825_v33 = vand.u32 2147483647, %v1809_v38 }
 0x1da   : > { %v3864_v13 = vpop.permute.xlu0 %1980 }
 0x1db   : > { %v1822_v28 = vand.u32 2147483647, %v1806_v16 }
 0x1dc   : > { %v1781_v62 = vpop.permute.xlu1 %1780 }
 0x1dd   : > { %v3867_v2 = vadd.f32 %v1822_v28, %v3776_v36  ;;  %v1808_v0 = vsub.f32 %v1781_v62, %v3827_v30  ;;  %v3924_v62 = vadd.f32 %v1819_v11, %v3808_v47  ;;  %v3939_v47 = vadd.f32 %v1825_v33, %v3830_v29 }
 0x1de   : > { %v3870_v50 = vpop.permute.xlu0 %1984 }
 0x1df   : > { %v1824_v40 = vand.u32 2147483647, %v1808_v0 }
 0x1e0   : > { %v1789_v1 = vpop.permute.xlu1 %1788 }
 0x1e1   : > { %v3873_v14 = vadd.f32 %v1824_v40, %v3781_v37  ;;  %v1810_v55 = vsub.f32 %v1789_v1, %v3827_v30  ;;  %v3888_v37 = vrot.slane %v3565_v12, %v1909_v20  ;;  %v3935_v40 = vadd.f32 %v1823_v46, %v3821_v3 }
 0x1e2   : > { %v3876_v56 = vpop.permute.xlu0 %1988 }
 0x1e3   : > { %v1826_v42 = vand.u32 2147483647, %v1810_v55  ;;  %v1914_v48 = vsub.f32 %v1857_v23, %v3888_v37 }
 0x1e5   : > { %v3880_v5 = vadd.f32 %v1826_v42, %v3788_v22  ;;  %v1849_v36 = vpop.permute.xlu1 %1848  ;;  %v3895_v22 = vrot.slane %v3565_v12, %v2025_v31  ;;  %v1911_v12 = vsub.f32 %v3839_v18, %v3888_v37  ;;  %v1930_v59 = vand.u32 2147483647, %v1914_v48  ;;  %v4337_v48 = vld [vmem:[#allocation35_spill] sm:$0xff] }
 0x1e6   : > { %v3883_v7 = vpop.permute.xlu0 %1992  ;;  %v1912_v23 = vsub.f32 %v1849_v36, %v3888_v37  ;;  %v3919_v18 = vadd.f32 %v1817_v43, %v3802_v15  ;;  %v3932_v15 = vadd.f32 %v1821_v34, %v3814_v45 }
 0x1e7   : > { %v2030_v63 = vsub.f32 %v1973_v41, %v3895_v22  ;;  %v1927_v30 = vand.u32 2147483647, %v1911_v12  ;;  %v2028_v41 = vsub.f32 %v3848_v4, %v3895_v22  ;;  %v2031_v49 = vsub.f32 %v3858_v60, %v3895_v22 }
 0x1e8   : > { %v2032_v0 = vsub.f32 %v3864_v13, %v3895_v22  ;;  %v1946_v4 = vadd.f32 %v1930_v59, %v3845_v53  ;;  %v1928_v1 = vand.u32 2147483647, %v1912_v23  ;;  %v2033_v45 = vsub.f32 %v3870_v50, %v3895_v22 }
 0x1e9   : > { %v1853_v52 = vpop.permute.xlu1 %1852  ;;  %v2046_v57 = vand.u32 2147483647, %v2030_v63  ;;  %v1943_v55 = vadd.f32 %v1927_v30, %v3836_v9  ;;  %v2044_v42 = vand.u32 2147483647, %v2028_v41  ;;  %v2034_v3 = vsub.f32 %v3876_v56, %v3895_v22 }
 0x1ea   : > { %v3897_v6 = vpop.permute.xlu0 %1996  ;;  %v1913_v32 = vsub.f32 %v1853_v52, %v3888_v37  ;;  %v3950_v36 = vand.u32 2147483647, %v2031_v49  ;;  %v3952_v29 = vand.u32 2147483647, %v2032_v0  ;;  %v2035_v9 = vsub.f32 %v3883_v7, %v3895_v22 }
 0x1eb   : > { %v3944_v20 = vadd.f32 %v2046_v57, %v1946_v4  ;;  %v1944_v52 = vadd.f32 %v1928_v1, %v1828_v10  ;;  %v2036_v54 = vsub.f32 %v3897_v6, %v3895_v22  ;;  %v3963_v7 = vand.u32 2147483647, %v2033_v45  ;;  %v4339_v45 = vld [vmem:[#allocation20_spill] sm:$0xff] }
 0x1ec   : > { %v1929_v31 = vand.u32 2147483647, %v1913_v32  ;;  %v3965_v12 = vand.u32 2147483647, %v2034_v3  ;;  %v3973_v59 = vand.u32 2147483647, %v2035_v9 }
 0x1ed   : > { %v3971_v46 = vadd.f32 %v2044_v42, %v1944_v52  ;;  %v3975_v23 = vand.u32 2147483647, %v2036_v54 }
 0x1ee   : > { %v3911_v17 = vpop.permute.xlu0 %2000  ;;  %v1961_v25 = vpop.permute.xlu1 %1960  ;;  %v1945_v63 = vadd.f32 %v1929_v31, %v3841_v8 }
 0x1ef   : > { %v2027_v60 = vsub.f32 %v1961_v25, %v3895_v22  ;;  %v2037_v50 = vsub.f32 %v3911_v17, %v3895_v22 }
 0x1f1   : > { %v2043_v26 = vand.u32 2147483647, %v2027_v60  ;;  %v3977_v33 = vand.u32 2147483647, %v2037_v50 }
 0x1f2   : > { %v2005_v16 = vpop.permute.xlu0 %2004  ;;  %v1969_v28 = vpop.permute.xlu1 %1968 }
 0x1f3   : > { %v2029_v13 = vsub.f32 %v1969_v28, %v3895_v22  ;;  %v2038_v27 = vsub.f32 %v2005_v16, %v3895_v22  ;;  %v2059_v30 = vadd.f32 %v2043_v26, %v1943_v55  ;;  %v4338_v16 = vmov 0.0  }
 0x1f5   : > { %v2045_v61 = vand.u32 2147483647, %v2029_v13  ;;  %v3979_v41 = vand.u32 2147483647, %v2038_v27 }
 0x1f6   : > { %v2009_v53 = vpop.permute.xlu0 %2008 }
 0x1f7   : > { %v1861_v44 = vpop.permute.xlu1 %1860  ;;  %v2039_v58 = vsub.f32 %v2009_v53, %v3895_v22  ;;  %v2061_v8 = vadd.f32 %v2045_v61, %v1945_v63  ;;  %v4341_v61 = vld [vmem:[#allocation28_spill] sm:$0xff] }
 0x1f8   : > { %v1915_v24 = vsub.f32 %v1861_v44, %v3888_v37  ;;  %v2469_v56 = vpop.f32.mrf.mxu0  ;;  %v4340_v44 = vld [vmem:[#allocation18_spill] sm:$0xff] }
 0x1f9   : > { %v989_v39 = vadd.f32 %v2469_v56, %v4337_v48  ;;  %v2477_v38 = vpop.f32.mrf.mxu1  ;;  %v3981_v57 = vand.u32 2147483647, %v2039_v58 }
 0x1fa   : > { %v997_v6 = vadd.f32 %v2477_v38, %v4337_v48  ;;  %v917_v43 = vpop.f32.mrf.mxu0  ;;  %v1931_v17 = vand.u32 2147483647, %v1915_v24  ;;  %v2013_v25 = vpop.permute.xlu0 %2012 }
 0x1fb   : > { %vm1005_vm0 = vcmp.lt.f32.partialorder %v989_v39, 16.0  ;;  %v987_v11 = vadd.f32 %v4337_v48, %v917_v43  ;;  %v1865_v34 = vpop.permute.xlu1 %1864  ;;  %vm1069_vm6 = vcmp.eq.f32.partialorder %v989_v39, 0.0  ;;  %v949_v10 = vpop.f32.mrf.mxu1  ;;  %v2040_v49 = vsub.f32 %v2013_v25, %v3895_v22 }
 0x1fc   : > { %v2400_v28 = vsel %vm1005_vm0, 1.0, %v4338_v16  ;;  %vm1013_vm7 = vcmp.lt.f32.partialorder %v997_v6, 16.0  ;;  %v2470_v0 = vpop.f32.mrf.mxu0  ;;  %v1947_v32 = vadd.f32 %v1931_v17, %v3916_v35  ;;  %v2416_v4 = vsel %vm1069_vm6, 1.0, %v4338_v16 }
 0x1fd   : > { %vm1077_vm9 = vcmp.eq.f32.partialorder %v997_v6, 0.0  ;;  %vm1003_vm11 = vcmp.lt.f32.partialorder %v987_v11, 16.0  ;;  %vm1067_vm12 = vcmp.eq.f32.partialorder %v987_v11, 0.0  ;;  %v995_v60 = vadd.f32 %v4337_v48, %v949_v10  ;;  %v2478_v42 = vpop.f32.mrf.mxu1 }
 0x1fe   : > { %v2398_v55 = vsel %vm1003_vm11, 1.0, %v4338_v16  ;;  %v1916_v13 = vsub.f32 %v1865_v34, %v3888_v37  ;;  %v1053_v3 = vmul.f32 %v2400_v28, %v4339_v45  ;;  %v2408_v53 = vsel %vm1013_vm7, 1.0, %v4338_v16  ;;  %v920_v54 = vpop.f32.mrf.mxu0 }
 0x1ff   : > { %v3987_v1 = vpop.permute.xlu1 %1868  ;;  %v2414_v35 = vsel %vm1067_vm12, 1.0, %v4338_v16  ;;  %v990_v9 = vadd.f32 %v2470_v0, %v4337_v48  ;;  %v1117_v31 = vmul.f32 %v2416_v4, %v4339_v45  ;;  %v1051_v52 = vmul.f32 %v2398_v55, %v4340_v44  ;;  %v952_v17 = vpop.f32.mrf.mxu1  ;;  %v4342_v0 = vld [vmem:[#allocation26_spill] sm:$0xff]  ;;  %v4343_v45 = vld [vmem:[#allocation21_spill] sm:$0xff] }
 0x200   : > { %vm1011_vm13 = vcmp.lt.f32.partialorder %v995_v60, 16.0  ;;  %vm1075_vm15 = vcmp.eq.f32.partialorder %v995_v60, 0.0  ;;  %v2424_v50 = vsel %vm1077_vm9, 1.0, %v4338_v16  ;;  %v1115_v24 = vmul.f32 %v2414_v35, %v4340_v44  ;;  %v2473_v10 = vpop.f32.mrf.mxu0  ;;  %v2017_v60 = vpop.permute.xlu0 %2016 }
 0x201   : > { %vm1006_vm14 = vcmp.lt.f32.partialorder %v990_v9, 16.0  ;;  %v998_v56 = vadd.f32 %v2478_v42, %v4337_v48  ;;  %v4005_v27 = vadd.f32 %v3950_v36, %v1947_v32  ;;  %v4008_v39 = vmul.f32 %v2408_v53, %v4341_v61 }
 0x202   : > { %v2406_v38 = vsel %vm1011_vm13, 1.0, %v4338_v16  ;;  %v1932_v58 = vand.u32 2147483647, %v1916_v13  ;;  %v2078_v43 = vmul.f32 %v2061_v8, %v1053_v3  ;;  %v4011_v63 = vand.u32 2147483647, %v2040_v49 }
 0x203   : > { %v4002_v26 = vpop.permute.xlu1 %1872  ;;  %v2422_v6 = vsel %vm1075_vm15, 1.0, %v4338_v16  ;;  %vm1070_vm1 = vcmp.eq.f32.partialorder %v990_v9, 0.0  ;;  %v2118_v25 = vmul.f32 %v2061_v8, %v1117_v31  ;;  %v4015_v11 = vmul.f32 %v2424_v50, %v4341_v61  ;;  %v4344_v50 = vld [vmem:[#allocation19_spill] sm:$0xff] }
 0x204   : > { %v2076_v34 = vmul.f32 %v2059_v30, %v1051_v52  ;;  %v2401_v36 = vsel %vm1006_vm14, 1.0, %v4338_v16  ;;  %v2116_v28 = vmul.f32 %v2059_v30, %v1115_v24  ;;  %v4019_v32 = vmul.f32 %v2406_v38, %v4342_v0  ;;  %v2481_v52 = vpop.f32.mrf.mxu1  ;;  %v4345_v38 = vld [vmem:[#allocation29_spill] sm:$0xff] }
 0x205   : > { %v2417_v4 = vsel %vm1070_vm1, 1.0, %v4338_v16  ;;  %vm1014_vm10 = vcmp.lt.f32.partialorder %v998_v56, 16.0  ;;  %v4025_v55 = vmul.f32 %v2422_v6, %v4342_v0  ;;  %v1948_v8 = vadd.f32 %v1932_v58, %v3851_v21 }
 0x206   : > { %v988_v13 = vadd.f32 %v4337_v48, %v920_v54  ;;  %v996_v42 = vadd.f32 %v4337_v48, %v952_v17  ;;  %v1054_v30 = vmul.f32 %v2401_v36, %v4343_v45  ;;  %vm1078_vm8 = vcmp.eq.f32.partialorder %v998_v56, 0.0 }
 0x207   : > { %v4022_v49 = vpop.permute.xlu1 %1876  ;;  %v1917_v3 = vsub.f32 %v3987_v1, %v3888_v37  ;;  %v993_v53 = vadd.f32 %v2473_v10, %v4337_v48  ;;  %v1118_v35 = vmul.f32 %v2417_v4, %v4343_v45  ;;  %v2409_v9 = vsel %vm1014_vm10, 1.0, %v4338_v16  ;;  %v933_v4 = vpop.f32.mrf.mxu0 }
 0x208   : > { %vm1004_vm5 = vcmp.lt.f32.partialorder %v988_v13, 16.0  ;;  %vm1068_vm4 = vcmp.eq.f32.partialorder %v988_v13, 0.0  ;;  %v2041_v21 = vsub.f32 %v2017_v60, %v3895_v22  ;;  %vm1012_vm2 = vcmp.lt.f32.partialorder %v996_v42, 16.0 }
 0x209   : > { %v2399_v31 = vsel %vm1004_vm5, 1.0, %v4338_v16  ;;  %v2415_v44 = vsel %vm1068_vm4, 1.0, %v4338_v16  ;;  %v2425_v1 = vsel %vm1078_vm8, 1.0, %v4338_v16  ;;  %vm1076_vm3 = vcmp.eq.f32.partialorder %v996_v42, 0.0  ;;  %v965_v42 = vpop.f32.mrf.mxu1 }
 0x20a   : > { %v1052_v24 = vmul.f32 %v2399_v31, %v4344_v50  ;;  %v1116_v56 = vmul.f32 %v2415_v44, %v4344_v50  ;;  %v4045_v61 = vadd.f32 %v3952_v29, %v1948_v8  ;;  %v4048_v58 = vmul.f32 %v2409_v9, %v4345_v38 }
 0x20b   : > { %v4039_v54 = vpop.permute.xlu1 %1880  ;;  %v1933_v6 = vand.u32 2147483647, %v1917_v3  ;;  %vm1009_vm0 = vcmp.lt.f32.partialorder %v993_v53, 16.0  ;;  %v2079_v17 = vmul.f32 %v3944_v20, %v1054_v30  ;;  %v2407_v0 = vsel %vm1012_vm2, 1.0, %v4338_v16 }
 0x20c   : > { %v2077_v36 = vmul.f32 %v3971_v46, %v1052_v24  ;;  %v2117_v10 = vmul.f32 %v3971_v46, %v1116_v56  ;;  %v2119_v60 = vmul.f32 %v3944_v20, %v1118_v35  ;;  %v4056_v13 = vmul.f32 %v2425_v1, %v4345_v38  ;;  %v4346_v46 = vld [vmem:[#allocation27_spill] sm:$0xff]  ;;  %v2474_v56 = vpop.f32.mrf.mxu0 }
 0x20d   : > { %v4058_v29 = vand.u32 2147483647, %v2041_v21  ;;  %v2423_v8 = vsel %vm1076_vm3, 1.0, %v4338_v16  ;;  %v2404_v9 = vsel %vm1009_vm0, 1.0, %v4338_v16  ;;  %vm1073_vm6 = vcmp.eq.f32.partialorder %v993_v53, 0.0 }
 0x20e   : > { %v2092_v30 = vadd.f32 %v2077_v36, %v2076_v34  ;;  %v2132_v3 = vadd.f32 %v2117_v10, %v2116_v28  ;;  %v4065_v31 = vmul.f32 %v2407_v0, %v4346_v46  ;;  %v1949_v20 = vadd.f32 %v1933_v6, %v3919_v18  ;;  %v4347_v28 = vld [vmem:[#allocation24_spill] sm:$0xff]  ;;  %v2482_v6 = vpop.f32.mrf.mxu1  ;;  %v4348_v10 = vld [vmem:[#allocation22_spill] sm:$0xff] }
 0x20f   : > { %v4061_v45 = vpop.permute.xlu1 %1884  ;;  %v1001_v35 = vadd.f32 %v2481_v52, %v4337_v48  ;;  %v991_v21 = vadd.f32 %v4337_v48, %v933_v4  ;;  %v4071_v50 = vmul.f32 %v2423_v8, %v4346_v46  ;;  %v999_v34 = vadd.f32 %v4337_v48, %v965_v42  ;;  %v936_v46 = vpop.f32.mrf.mxu0 }
 0x210   : > { %v2093_v44 = vadd.f32 %v2092_v30, %v2078_v43  ;;  %v2133_v1 = vadd.f32 %v2132_v3, %v2118_v25  ;;  %v1057_v24 = vmul.f32 %v2404_v9, %v4347_v28  ;;  %v2420_v53 = vsel %vm1073_vm6, 1.0, %v4338_v16 }
 0x211   : > { %vm1007_vm7 = vcmp.lt.f32.partialorder %v991_v21, 16.0  ;;  %vm1071_vm9 = vcmp.eq.f32.partialorder %v991_v21, 0.0  ;;  %v2065_v36 = vadd.f32 %v3963_v7, %v1949_v20  ;;  %vm1017_vm11 = vcmp.lt.f32.partialorder %v1001_v35, 16.0  ;;  %v968_v20 = vpop.f32.mrf.mxu1 }
 0x212   : > { %v2402_v18 = vsel %vm1007_vm7, 1.0, %v4338_v16  ;;  %v2418_v52 = vsel %vm1071_vm9, 1.0, %v4338_v16  ;;  %v2094_v43 = vadd.f32 %v2093_v44, %v2079_v17  ;;  %v2134_v25 = vadd.f32 %v2133_v1, %v2119_v60 }
 0x213   : > { %v4076_v38 = vpop.permute.xlu1 %1888  ;;  %v1055_v0 = vmul.f32 %v2402_v18, %v4348_v10  ;;  %v1119_v4 = vmul.f32 %v2418_v52, %v4348_v10  ;;  %vm1015_vm12 = vcmp.lt.f32.partialorder %v999_v34, 16.0  ;;  %vm1079_vm13 = vcmp.eq.f32.partialorder %v999_v34, 0.0  ;;  %v4349_v10 = vld [vmem:[#allocation30_spill] sm:$0xff] }
 0x214   : > { %v1918_v8 = vsub.f32 %v4002_v26, %v3888_v37  ;;  %v994_v42 = vadd.f32 %v2474_v56, %v4337_v48  ;;  %v1121_v30 = vmul.f32 %v2420_v53, %v4347_v28  ;;  %vm1081_vm15 = vcmp.eq.f32.partialorder %v1001_v35, 0.0 }
 0x215   : > { %v2080_v17 = vmul.f32 %v4005_v27, %v1055_v0  ;;  %v2120_v60 = vmul.f32 %v4005_v27, %v1119_v4  ;;  %v4090_v3 = vsel %vm1017_vm11, 1.0, %v4338_v16  ;;  %v2410_v44 = vsel %vm1015_vm12, 1.0, %v4338_v16  ;;  %v4350_v4 = vld [vmem:[#allocation25_spill] sm:$0xff] }
 0x216   : > { %v1934_v9 = vand.u32 2147483647, %v1918_v8  ;;  %vm1010_vm14 = vcmp.lt.f32.partialorder %v994_v42, 16.0  ;;  %vm1074_vm1 = vcmp.eq.f32.partialorder %v994_v42, 0.0  ;;  %v2426_v35 = vsel %vm1079_vm13, 1.0, %v4338_v16 }
 0x217   : > { %v1893_v7 = vpop.permute.xlu1 %1892  ;;  %v2095_v21 = vadd.f32 %v2094_v43, %v2080_v17  ;;  %v2135_v26 = vadd.f32 %v2134_v25, %v2120_v60  ;;  %v2082_v1 = vmul.f32 %v2065_v36, %v1057_v24  ;;  %v4097_v27 = vsel %vm1081_vm15, 1.0, %v4338_v16 }
 0x218   : > { %v1950_v28 = vadd.f32 %v1934_v9, %v3855_v19  ;;  %v2405_v53 = vsel %vm1010_vm14, 1.0, %v4338_v16  ;;  %v2122_v56 = vmul.f32 %v2065_v36, %v1121_v30  ;;  %v2421_v18 = vsel %vm1074_vm1, 1.0, %v4338_v16  ;;  %v4351_v9 = vld [vmem:[#allocation23_spill] sm:$0xff] }
 0x219   : > { %v992_v52 = vadd.f32 %v4337_v48, %v936_v46  ;;  %v1000_v43 = vadd.f32 %v4337_v48, %v968_v20  ;;  %v4105_v0 = vmul.f32 %v2410_v44, %v4349_v10  ;;  %v4108_v34 = vmul.f32 %v2426_v35, %v4349_v10 }
 0x21a   : > { %v2066_v24 = vadd.f32 %v3965_v12, %v1950_v28  ;;  %v1919_v19 = vsub.f32 %v4022_v49, %v3888_v37  ;;  %v1058_v36 = vmul.f32 %v2405_v53, %v4350_v4  ;;  %v1122_v8 = vmul.f32 %v2421_v18, %v4350_v4 }
 0x21b   : > { %v1897_v25 = vpop.permute.xlu1 %1896  ;;  %vm1008_vm10 = vcmp.lt.f32.partialorder %v992_v52, 16.0  ;;  %vm1072_vm8 = vcmp.eq.f32.partialorder %v992_v52, 0.0  ;;  %vm1016_vm5 = vcmp.lt.f32.partialorder %v1000_v43, 16.0  ;;  %v4116_v42 = vadd.f32 %v2482_v6, %v4337_v48 }
 0x21c   : > { %v2403_v30 = vsel %vm1008_vm10, 1.0, %v4338_v16  ;;  %v2419_v17 = vsel %vm1072_vm8, 1.0, %v4338_v16  ;;  %v2083_v60 = vmul.f32 %v2066_v24, %v1058_v36  ;;  %vm1080_vm4 = vcmp.eq.f32.partialorder %v1000_v43, 0.0 }
 0x21d   : > { %v1056_v12 = vmul.f32 %v2403_v30, %v4351_v9  ;;  %v1120_v46 = vmul.f32 %v2419_v17, %v4351_v9  ;;  %v2123_v20 = vmul.f32 %v2066_v24, %v1122_v8  ;;  %v2411_v44 = vsel %vm1016_vm5, 1.0, %v4338_v16 }
 0x21e   : > { %v1935_v35 = vand.u32 2147483647, %v1919_v19  ;;  %v1920_v28 = vsub.f32 %v4039_v54, %v3888_v37  ;;  %v2427_v53 = vsel %vm1080_vm4, 1.0, %v4338_v16  ;;  %v1921_v18 = vsub.f32 %v4061_v45, %v3888_v37 }
 0x21f   : > { %v1901_v49 = vpop.permute.xlu1 %1900  ;;  %v2081_v48 = vmul.f32 %v4045_v61, %v1056_v12  ;;  %v2121_v6 = vmul.f32 %v4045_v61, %v1120_v46  ;;  %v1922_v10 = vsub.f32 %v4076_v38, %v3888_v37  ;;  %v1923_v24 = vsub.f32 %v1893_v7, %v3888_v37 }
 0x220   : > { %v1951_v52 = vadd.f32 %v1935_v35, %v3924_v62  ;;  %v1936_v43 = vand.u32 2147483647, %v1920_v28  ;;  %vm1018_vm2 = vcmp.lt.f32.partialorder %v4116_v42, 16.0  ;;  %vm1082_vm3 = vcmp.eq.f32.partialorder %v4116_v42, 0.0 }
 0x221   : > { %v2096_v54 = vadd.f32 %v2095_v21, %v2081_v48  ;;  %v2136_v19 = vadd.f32 %v2135_v26, %v2121_v6  ;;  %v1937_v61 = vand.u32 2147483647, %v1921_v18  ;;  %v1924_v4 = vsub.f32 %v1897_v25, %v3888_v37  ;;  %v4352_v6 = vld [vmem:[#allocation31_spill] sm:$0xff] }
 0x222   : > { %v2067_v36 = vadd.f32 %v3973_v59, %v1951_v52  ;;  %v1952_v45 = vadd.f32 %v1936_v43, %v3861_v51  ;;  %v1938_v62 = vand.u32 2147483647, %v1922_v10  ;;  %v1939_v8 = vand.u32 2147483647, %v1923_v24  ;;  %v4353_v24 = vld [vmem:[#allocation33_spill] sm:$0xff] }
 0x223   : > { %v2097_v30 = vadd.f32 %v2096_v54, %v2082_v1  ;;  %v2137_v17 = vadd.f32 %v2136_v19, %v2122_v56  ;;  %v1953_v38 = vadd.f32 %v1937_v61, %v3932_v15  ;;  %v1940_v7 = vand.u32 2147483647, %v1924_v4  ;;  %v1905_v9 = vpop.permute.xlu1 %1904 }
 0x224   : > { %v2084_v12 = vmul.f32 %v2067_v36, %v4019_v32  ;;  %v2124_v21 = vmul.f32 %v2067_v36, %v4025_v55  ;;  %v2068_v26 = vadd.f32 %v3975_v23, %v1952_v45  ;;  %v1954_v25 = vadd.f32 %v1938_v62, %v3867_v2  ;;  %v4354_v45 = vld [vmem:[#allocation34_spill] sm:$0xff] }
 0x225   : > { %v2098_v46 = vadd.f32 %v2097_v30, %v2083_v60  ;;  %v2138_v59 = vadd.f32 %v2137_v17, %v2123_v20  ;;  %v2069_v51 = vadd.f32 %v3977_v33, %v1953_v38  ;;  %v1955_v35 = vadd.f32 %v1939_v8, %v3935_v40 }
 0x226   : > { %v2085_v1 = vmul.f32 %v2068_v26, %v4065_v31  ;;  %v2125_v15 = vmul.f32 %v2068_v26, %v4071_v50  ;;  %v2070_v56 = vadd.f32 %v3979_v41, %v1954_v25  ;;  %v1956_v32 = vadd.f32 %v1940_v7, %v3873_v14 }
 0x227   : > { %v2099_v28 = vadd.f32 %v2098_v46, %v2084_v12  ;;  %v2139_v55 = vadd.f32 %v2138_v59, %v2124_v21  ;;  %v2086_v23 = vmul.f32 %v2069_v51, %v4008_v39  ;;  %v2126_v2 = vmul.f32 %v2069_v51, %v4015_v11 }
 0x228   : > { %v2087_v60 = vmul.f32 %v2070_v56, %v4048_v58  ;;  %v2127_v33 = vmul.f32 %v2070_v56, %v4056_v13  ;;  %v2071_v40 = vadd.f32 %v3981_v57, %v1955_v35  ;;  %v2072_v31 = vadd.f32 %v4011_v63, %v1956_v32  ;;  %v2021_v48 = vpop.permute.xlu1 %2020  ;;  %v2075_v56 = vld [vmem:[#allocation3] sm:$0x1]  ;;  %v2115_v32 = vld [vmem:[#allocation4] sm:$0x1] }
 0x229   : > { %v2100_v20 = vadd.f32 %v2099_v28, %v2085_v1  ;;  %v2140_v50 = vadd.f32 %v2139_v55, %v2125_v15  ;;  %v1925_v41 = vsub.f32 %v1901_v49, %v3888_v37  ;;  %v1926_v14 = vsub.f32 %v1905_v9, %v3888_v37 }
 0x22a   : > { %v1064_v18 = vmul.f32 %v2411_v44, %v4352_v6  ;;  %v1128_v39 = vmul.f32 %v2427_v53, %v4352_v6  ;;  %v2088_v11 = vmul.f32 %v2071_v40, %v4105_v0  ;;  %v2128_v58 = vmul.f32 %v2071_v40, %v4108_v34 }
 0x22b   : > { %v2101_v13 = vadd.f32 %v2100_v20, %v2086_v23  ;;  %v2141_v52 = vadd.f32 %v2140_v50, %v2126_v2  ;;  %v1941_v57 = vand.u32 2147483647, %v1925_v41  ;;  %v1942_v43 = vand.u32 2147483647, %v1926_v14 }
 0x22c   : > { %v2413_v63 = vsel %vm1018_vm2, 1.0, %v4338_v16  ;;  %v2429_v37 = vsel %vm1082_vm3, 1.0, %v4338_v16  ;;  %v2089_v49 = vmul.f32 %v2072_v31, %v1064_v18  ;;  %v2042_v44 = vsub.f32 %v2021_v48, %v3895_v22 }
 0x22d   : > { %v2102_v53 = vadd.f32 %v2101_v13, %v2087_v60  ;;  %v2142_v10 = vadd.f32 %v2141_v52, %v2127_v33  ;;  %v2129_v0 = vmul.f32 %v2072_v31, %v1128_v39  ;;  %v1957_v34 = vadd.f32 %v1941_v57, %v3939_v47 }
 0x22e   : > { %v1065_v54 = vmul.f32 %v4090_v3, %v4353_v24  ;;  %v1958_v19 = vadd.f32 %v1942_v43, %v3880_v5  ;;  %v2058_v61 = vand.u32 2147483647, %v2042_v44  ;;  %v1129_v4 = vmul.f32 %v4097_v27, %v4353_v24 }
 0x22f   : > { %v2103_v36 = vadd.f32 %v2102_v53, %v2088_v11  ;;  %v2143_v42 = vadd.f32 %v2142_v10, %v2128_v58  ;;  %v2073_v16 = vadd.f32 %v4058_v29, %v1957_v34  ;;  %v1066_v22 = vmul.f32 %v2413_v63, %v4354_v45 }
 0x230   : > { %v1130_v62 = vmul.f32 %v2429_v37, %v4354_v45  ;;  %v2074_v8 = vadd.f32 %v2058_v61, %v1958_v19 }
 0x231   : > { %v2104_v30 = vadd.f32 %v2103_v36, %v2089_v49  ;;  %v2144_v47 = vadd.f32 %v2143_v42, %v2129_v0  ;;  %v2090_v17 = vmul.f32 %v2073_v16, %v1065_v54  ;;  %v2130_v38 = vmul.f32 %v2073_v16, %v1129_v4 }
 0x232   : > { %v2091_v3 = vmul.f32 %v2074_v8, %v1066_v22  ;;  %v2131_v7 = vmul.f32 %v2074_v8, %v1130_v62 }
 0x233   : > { %v2105_v5 = vadd.f32 %v2104_v30, %v2090_v17  ;;  %v2145_v9 = vadd.f32 %v2144_v47, %v2130_v38 }
 0x235   : > { %v2106_v12 = vadd.f32 %v2105_v5, %v2091_v3  ;;  %v2146_v21 = vadd.f32 %v2145_v9, %v2131_v7 }
 0x237   : > { %v2107_v27 = vrot.slane %v2106_v12, 4  ;;  %v2147_v26 = vrot.slane %v2146_v21, 4 }
 0x239   : > { %v2108_v25 = vadd.f32 %v2107_v27, %v2106_v12  ;;  %v2148_v46 = vadd.f32 %v2147_v26, %v2146_v21 }
 0x23b   : > { %v2109_v29 = vrot.slane %v2108_v25, 2  ;;  %v2149_v59 = vrot.slane %v2148_v46, 2 }
 0x23d   : > { %v2110_v51 = vadd.f32 %v2109_v29, %v2108_v25  ;;  %v2150_v35 = vadd.f32 %v2149_v59, %v2148_v46 }
 0x23f   : > { %v2111_v1 = vrot.slane %v2110_v51, 1  ;;  %v2151_v15 = vrot.slane %v2150_v35, 1 }
 0x241   : > { %v2112_v28 = vadd.f32 %v2111_v1, %v2110_v51  ;;  %v2152_v55 = vadd.f32 %v2151_v15, %v2150_v35  ;;  %2182 = sbr.rel (%p2430_p3) target bundleno = 596 (0x254), region = 48 }
 0x243   : > { %v2113_v23 = vadd.f32 %v2112_v28, %v2075_v56  ;;  %v2153_v2 = vadd.f32 %v2152_v55, %v2115_v32 }
 0x245   : > { %2114 = vst [vmem:[#allocation3] sm:$0x1] %v2113_v23  ;;  %2154 = vst [vmem:[#allocation4] sm:$0x1] %v2153_v2 }
 0x246   : > { %v2183_v60 = vld [vmem:[#allocation2] sm:$0x1] }
 0x247   : > { %v2184_v33 = vmin.f32 %v2183_v60, 16.0 }
 0x249   : > { %v2187_v31 = vsub.f32 16.0, %v2184_v33 }
 0x24c   : > { %v2186_v40 = vld [vmem:[#allocation4] sm:$0x1]  ;;  %v2185_v20 = vld [vmem:[#allocation3] sm:$0x1] }
 0x24d   : > { %v2188_v50 = vmul.f32 %v2187_v31, %v2186_v40 }
 0x24f   : > { %v2189_v41 = vadd.f32 %v2188_v50, %v2185_v20 }
 0x251   : > { %v2190_v14 = vmul.f32 0.0625, %v2189_v41 }
 0x253   : > { %2191 = vst [vmem:[%s2907_s13] sm:$0x1] %v2190_v14 }
 0x254 PF: > { %s2431_s15 = sshll.u32 %s2734_s23, 1  ;;  %s2207_s21 = sshll.u32 %s2907_s13, 4  ;;  %s2208_s21 = int_to_ptr.vmem [resolvable:$true] %s2207_s21 }
 0x255   : > { %s2203_s7 = sadd.s32 %s2730_s22, %s2431_s15  ;;  %s4355_s6 = sand.u32 1, %s2718_s19  }
 0x256   : > { %s2432_s24 = sshll.u32 %s2203_s7, 4  ;;  %s2193_s9 = scalar_lea.sflag [#allocation6], %s4355_s6 }
 0x257   : > { %s2205_s30 = scalar_lea.hbm %s4239_s5, %s2432_s24  ;;  %s2642_s14 = scalar_lea.vmem %s2208_s21, 16 }
 0x258   : > { %p2643_p4 = scmp.ne.s32.totalorder %s2208_s21, %s2642_s14  ;;  %s2763_s16 = smov [#allocation5]  }
 0x259   : > { %s2646_s29 = sshll.u32 %s2763_s16, 4  ;;  %s2647_s29 = int_to_ptr.vmem [resolvable:$false] %s2646_s29 }
 0x25a   : > { %p2644_p5 = pnand %p2643_p4, %p2856_p6  ;;  %s2648_s12 = scalar_lea.vmem %s2647_s29, 32 }
 0x25b   : > { %p2649_p9 = scmp.lt.s32.totalorder %s2208_s21, %s2647_s29  ;;  %p2650_p10 = scmp.lt.s32.totalorder %s2648_s12, %s2642_s14 }
 0x25c   : > { %p2645_p8 = pneg %p2644_p5 }
 0x25d   : > { %p2651_p11 = por %p2650_p10, %p2649_p9 }
 0x25f   : > { %p2652_p12 = pnand %p2651_p11, %p2645_p8 }
 0x261   : > { %2655 = shalt.err (!%p2652_p12)
}
 0x262   : > { %s2656_s22 = scalar_lea.hbm %s2205_s30, 16  ;;  %s2660_s17 = scalar_lea.hbm %s4239_s5, 64 }
 0x263   : > { %p2657_p13 = scmp.ne.s32.totalorder %s2205_s30, %s2656_s22  ;;  %p2661_p2 = scmp.lt.s32.totalorder %s2205_s30, %s4239_s5 }
 0x264   : > { %p2662_p3 = scmp.lt.s32.totalorder %s2660_s17, %s2656_s22 }
 0x265   : > { %p2658_p0 = pnand %p2657_p13, %p2856_p6 }
 0x266   : > { %p2663_p4 = por %p2662_p3, %p2661_p2 }
 0x267   : > { %p2659_p1 = pneg %p2658_p0 }
 0x269   : > { %p2664_p5 = pnand %p2663_p4, %p2659_p1 }
 0x26b   : > { %2667 = shalt.err (!%p2664_p5)
}
 0x26c   : > { %2499 = dma.vmem_to_hbm [thread:$0]  (%p2856_p6), %s2208_s21, 16, %s2205_s30, %s2193_s9  }
 0x26d PF: > { %p2505_p8 = scmp.ge.s32.totalorder %s2750_s27, 2  ;;  %s2219_s20 = sand.u32 1, %s2714_s18  }
 0x26e   : > { %s2220_s15 = scalar_lea.sflag [#allocation6], %s2219_s20 }
 0x26f   : > { %p2502_p9 = pnand %p2505_p8, %p2863_p7 }
 0x271   : > { %p2503_p10 = pneg %p2502_p9 }
 0x273   : > { %2709 = dma.done.wait (%p2503_p10), %s2220_s15, 16  }
 0x274   : > { %2711 = vsyncadd (%p2503_p10), %s2220_s15, 4294967280  ;;  %s18_s27 = sadd.s32 1, %s2750_s27   ;;  %s4357_s7 = sld [smem:[#allocation8_spill]] }
 0x275   : > { %p15_p11 = scmp.ge.s32.totalorder %s18_s27, 10   ;;  %s4358_s20 = sld [smem:[#allocation16_spill]] }
 0x276   : > { %s4359_s21 = sld [smem:[#allocation9_spill]]  ;;  %s4365_s18 = smov %s2718_s19 }
 0x277   : > { %s4360_s22 = sld [smem:[#allocation10_spill]]  ;;  %17 = sbr.rel (!%p15_p11) target bundleno = 6 (0x6), region = 92 }
 0x278   : > { %s4361_s23 = sld [smem:[#allocation11_spill]] }
 0x279   : > { %s4362_s24 = sld [smem:[#allocation12_spill]] }
 0x27a   : > { %s4363_s25 = sld [smem:[#allocation13_spill]]  ;;  %s4366_s19 = smov %s4357_s7 }
 0x27b   : > { %s4364_s26 = sld [smem:[#allocation15_spill]] }
 0x27c   :  { %2224 = vsyncpa [#allocation6], 1 }
 0x27d   :  { %2226 = vsyncpa [#allocation6 + $0x1], 1 }

</bundles_post_ra>
